<compile_context>
chip_gen: v7x
topology: tpu7x:2x2x1
jax: 0.10.0
libtpu: 0.0.40
codegen_flags: <defaults>
</compile_context>

<pallas_src>
import functools

import jax
import jax.numpy as jnp
from jax import lax
from jax.experimental import pallas as pl
from jax.experimental.pallas import tpu as pltpu

_K = 8      # Conv1d kernel size of the module
_LPAD = 8   # sublane-aligned left halo inside VMEM scratch (multiple of 8, >= 3)


# --------------------------------------------------------------------------- #
# Fused kernel: one batch element, all three conv+relu layers in VMEM.
# --------------------------------------------------------------------------- #
def _nmf_fused_kernel(x_ref, w1_ref, b1_ref, w2_ref, b2_ref, w3_ref, b3_ref,
                      o_ref, *scratch, T, K, left, n_comp, l1_im2col):
    right = K - 1 - left
    L = _LPAD

    def stage(dst_ref, vals_f32):
        # Write payload rows [L, L+T) and zero the halo rows so the next conv
        # sees PyTorch 'same' zero padding.  Halos are re-zeroed every grid step
        # (scratch is per-core and not zero-initialised; cheap: a few rows).
        c = dst_ref.shape[1]
        dst_ref[0:L, :] = jnp.zeros((L, c), dst_ref.dtype)
        if right > 0:
            dst_ref[L + T:L + T + right, :] = jnp.zeros((right, c), dst_ref.dtype)
        dst_ref[L:L + T, :] = vals_f32.astype(dst_ref.dtype)

    def conv_relu(src_ref, w_ref, b_ref):
        # src_ref: (L+T+right, Cin) f32 scratch with zero halo rows.
        # w_ref:   (K, Cin, Cout) bf16.  K shifted [T,Cin]@[Cin,Cout] MXU
        # matmuls (bf16 operands) accumulated in f32; bias + ReLU in f32.
        acc = None
        for k in range(K):
            lhs = src_ref[L - left + k:L - left + k + T, :].astype(jnp.bfloat16)
            d = jnp.dot(lhs, w_ref[k], preferred_element_type=jnp.float32)
            acc = d if acc is None else acc + d
        return jnp.maximum(acc + b_ref[0], 0.0)

    if l1_im2col:
        # Layer 1 as one wide matmul: x_ref holds the pre-built [T, K*Cin]
        # patch matrix; w1_ref is the pre-flattened (K*Cin, 256) weight.
        h1p_ref, h2p_ref = scratch
        a1 = jnp.maximum(
            jnp.dot(x_ref[0], w1_ref[...], preferred_element_type=jnp.float32)
            + b1_ref[0], 0.0)
    else:
        xp_ref, h1p_ref, h2p_ref = scratch
        stage(xp_ref, x_ref[0].astype(jnp.float32))
        a1 = conv_relu(xp_ref, w1_ref, b1_ref)

    stage(h1p_ref, a1)                        # layer-1 activations stay in VMEM
    a2 = conv_relu(h1p_ref, w2_ref, b2_ref)
    stage(h2p_ref, a2)                        # layer-2 activations stay in VMEM
    a3 = conv_relu(h2p_ref, w3_ref, b3_ref)   # (T, Cout3_padded_to_128) f32

    # Lane-dense output: (n_comp, T) with T on the 128-lane axis; drop the
    # zero-padded channels that were added at pack time.
    o_ref[0] = jnp.transpose(a3)[:n_comp, :].astype(o_ref.dtype)


# --------------------------------------------------------------------------- #
# pallas_call wrapper
# --------------------------------------------------------------------------- #
def _nmf_pallas(x, packed, *, n_comp, K, l1_im2col):
    (w1, b1), (w2, b2), (w3, b3) = packed
    B, T, c_in = x.shape
    left = (K - 1) // 2
    right = K - 1 - left
    c1_in = w2.shape[1]   # 256
    c2_in = w3.shape[1]   # 128

    kernel = functools.partial(
        _nmf_fused_kernel, T=T, K=K, left=left, n_comp=n_comp,
        l1_im2col=l1_im2col)

    def const_spec(shape):
        # Weights / biases: same block every grid step -> DMA'd once, stay in VMEM.
        if len(shape) == 2:
            return pl.BlockSpec(shape, lambda b: (0, 0))
        return pl.BlockSpec(shape, lambda b: (0, 0, 0))

    in_specs = [
        pl.BlockSpec((1, T, c_in), lambda b: (b, 0, 0)),
        const_spec(w1.shape), const_spec(b1.shape),
        const_spec(w2.shape), const_spec(b2.shape),
        const_spec(w3.shape), const_spec(b3.shape),
    ]

    rows = _LPAD + T + right
    scratch = []
    if not l1_im2col:
        scratch.append(pltpu.VMEM((rows, c_in), jnp.float32))   # padded input
    scratch += [pltpu.VMEM((rows, c1_in), jnp.float32),          # padded layer-1 act
                pltpu.VMEM((rows, c2_in), jnp.float32)]          # padded layer-2 act

    return pl.pallas_call(
        kernel,
        out_shape=jax.ShapeDtypeStruct((B, n_comp, T), jnp.float32),
        grid=(B,),
        in_specs=in_specs,
        out_specs=pl.BlockSpec((1, n_comp, T), lambda b: (b, 0, 0)),
        scratch_shapes=scratch,
        compiler_params=pltpu.CompilerParams(
            dimension_semantics=("parallel",)),
    )(x, w1, b1, w2, b2, w3, b3)


# --------------------------------------------------------------------------- #
# Parameter handling (hoisted out of the jitted forward)
# --------------------------------------------------------------------------- #
def init_nmf_encoder_params(n_freq, n_comp, key):
    """PyTorch-layout params mimicking nn.Conv1d default (kaiming-uniform) init."""
    K = _K
    dims = [(n_freq, 256), (256, 128), (128, n_comp)]
    params = []
    for i, (cin, cout) in enumerate(dims):
        kw, kb = jax.random.split(jax.random.fold_in(key, i))
        bound = 1.0 / jnp.sqrt(cin * K)
        w = jax.random.uniform(kw, (cout, cin, K), jnp.float32, -bound, bound)
        b = jax.random.uniform(kb, (cout,), jnp.float32, -bound, bound)
        params.append((w, b))
    return params


def pack_params(params):
    """Convert PyTorch-layout params into kernel-ready tensors (done ONCE).

    In:  [(w: (Cout, Cin, K) f32, b: (Cout,) f32)] per layer (PyTorch layout).
    Out: ((w, b), ...) with w: (K, Cin, Cout) bf16 — or (K*Cin, Cout) bf16 for
         layer 1 when Cin < 128 (im2col) — and b: (1, Cout) f32.  The last
         layer's Cout is zero-padded to a multiple of 128 for lane-aligned
         stores; the kernel slices back to n_comp.
    """
    n = len(params)
    packed = []
    for i, (w, b) in enumerate(params):
        cout, cin, k = w.shape
        w_kio = jnp.transpose(w, (2, 1, 0))                       # (K, Cin, Cout)
        if i == n - 1 and cout % 128 != 0:
            pad = 128 * ((cout + 127) // 128) - cout
            w_kio = jnp.pad(w_kio, ((0, 0), (0, 0), (0, pad)))
            b = jnp.pad(b, (0, pad))
        if i == 0 and cin < 128:
            w_kio = w_kio.reshape(k * cin, w_kio.shape[-1])       # im2col weight
        packed.append((w_kio.astype(jnp.bfloat16),
                       b.reshape(1, -1).astype(jnp.float32)))
    return tuple(packed)


def make_nmf_encoder(params):
    """Build a jitted forward: X (B, n_freq, T) f32 -> Hhat (B, n_comp, T) f32."""
    packed = pack_params(params)
    n_comp = params[-1][0].shape[0]
    K = params[0][0].shape[2]
    l1_im2col = packed[0][0].ndim == 2
    left = (K - 1) // 2
    right = K - 1 - left

    @jax.jit
    def forward(X):
        B, _, T = X.shape
        h = jnp.transpose(X, (0, 2, 1)).astype(jnp.bfloat16)      # (B, T, n_freq)
        if l1_im2col:
            # Build the layer-1 im2col operand (cheap: n_freq < 128):
            # patches[b, t, k*C0 + c] = x_same_pad[b, t + k, c].
            hp = jnp.pad(h, ((0, 0), (left, right), (0, 0)))
            h = jnp.concatenate([hp[:, k:k + T, :] for k in range(K)], axis=-1)
        return _nmf_pallas(h, packed, n_comp=n_comp, K=K, l1_im2col=l1_im2col)

    return forward


# --------------------------------------------------------------------------- #
# Pure-JAX references
# --------------------------------------------------------------------------- #
def _reference_forward_bf16(X, params):
    """Mirrors the kernel's precision: bf16 operands, f32 accumulation,
    bf16 intermediates, f32 final layer.  PyTorch 'same' (3 left / 4 right)."""
    n = len(params)
    h = jnp.transpose(X, (0, 2, 1)).astype(jnp.bfloat16)          # (B, T, C)
    for i, (w, b) in enumerate(params):
        cout, cin, k = w.shape
        left = (k - 1) // 2
        T = h.shape[1]
        hp = jnp.pad(h, ((0, 0), (left, k - 1 - left), (0, 0)))
        w_kio = jnp.transpose(w, (2, 1, 0)).astype(jnp.bfloat16)  # (K, Cin, Cout)
        y = sum(jnp.einsum("btc,co->bto", hp[:, j:j + T, :], w_kio[j],
                           preferred_element_type=jnp.float32)
                for j in range(k))
        y = jnp.maximum(y + b[None, None, :], 0.0)
        h = y if i == n - 1 else y.astype(jnp.bfloat16)
    return jnp.transpose(h, (0, 2, 1))                            # (B, n_comp, T)


def _reference_forward_f32(X, params):
    """Full-precision reference with PyTorch Conv1d('same') semantics."""
    h = X
    for w, b in params:
        k = w.shape[2]
        left = (k - 1) // 2
        y = lax.conv_general_dilated(
            h, w, window_strides=(1,), padding=[(left, k - 1 - left)],
            dimension_numbers=("NCH", "OIH", "NCH"))
        h = jnp.maximum(y + b[None, :, None], 0.0)
    return h


# --------------------------------------------------------------------------- #
if __name__ == "__main__":
    configs = [
        (2, 64, 16, 32),    # exercises the im2col layer-1 path (n_freq < 128)
        (1, 136, 24, 16),   # exercises the 8-tap layer-1 path (n_freq >= 128)
    ]
    for (B, n_freq, T, n_comp) in configs:
        key = jax.random.PRNGKey(0)
        kx, kp = jax.random.split(key)
        X = jax.random.uniform(kx, (B, n_freq, T), jnp.float32)
        params = init_nmf_encoder_params(n_freq, n_comp, kp)

        forward = make_nmf_encoder(params)
        Hhat = jax.block_until_ready(forward(X))
        assert Hhat.shape == (B, n_comp, T), Hhat.shape

        ref_bf16 = _reference_forward_bf16(X, params)
        err = float(jnp.max(jnp.abs(Hhat - ref_bf16)))
        assert jnp.allclose(Hhat, ref_bf16, atol=5e-3, rtol=5e-3), err

        ref_f32 = _reference_forward_f32(X, params)
        err32 = float(jnp.max(jnp.abs(Hhat - ref_f32)))
        assert jnp.allclose(Hhat, ref_f32, atol=5e-2, rtol=5e-2), err32

    print("KERNEL_OK")
</pallas_src>

<mosaic_0001>
module attributes {stable_mosaic.version = 11 : i64} {
  func.func @_nmf_fused_kernel(%arg0: i32, %arg1: memref<1x16x512xbf16, #tpu.memory_space<vmem>>, %arg2: memref<512x256xbf16, #tpu.memory_space<vmem>>, %arg3: memref<1x256xf32, #tpu.memory_space<vmem>>, %arg4: memref<8x256x128xbf16, #tpu.memory_space<vmem>>, %arg5: memref<1x128xf32, #tpu.memory_space<vmem>>, %arg6: memref<8x128x128xbf16, #tpu.memory_space<vmem>>, %arg7: memref<1x128xf32, #tpu.memory_space<vmem>>, %arg8: memref<1x32x16xf32, #tpu.memory_space<vmem>>, %arg9: memref<28x256xf32, #tpu.memory_space<vmem>>, %arg10: memref<28x128xf32, #tpu.memory_space<vmem>>) attributes {dimension_semantics = [#tpu.dimension_semantics<parallel>], iteration_bounds = array<i64: 2>, scalar_prefetch = 0 : i64, scratch_operands = 2 : i64, tpu.core_type = #tpu.core_type<tc>, window_params = [{transform_indices = @transform_0, window_bounds = array<i64: 1, 16, 512>}, {pipeline_mode = #tpu.pipeline_mode<synchronous>, transform_indices = @transform_1, window_bounds = array<i64: 512, 256>}, {pipeline_mode = #tpu.pipeline_mode<synchronous>, transform_indices = @transform_2, window_bounds = array<i64: 1, 256>}, {pipeline_mode = #tpu.pipeline_mode<synchronous>, transform_indices = @transform_3, window_bounds = array<i64: 8, 256, 128>}, {pipeline_mode = #tpu.pipeline_mode<synchronous>, transform_indices = @transform_4, window_bounds = array<i64: 1, 128>}, {pipeline_mode = #tpu.pipeline_mode<synchronous>, transform_indices = @transform_5, window_bounds = array<i64: 8, 128, 128>}, {pipeline_mode = #tpu.pipeline_mode<synchronous>, transform_indices = @transform_6, window_bounds = array<i64: 1, 128>}, {transform_indices = @transform_7, window_bounds = array<i64: 1, 32, 16>}]} {
    %c0 = arith.constant 0 : index
    %c0_0 = arith.constant 0 : index
    %c0_1 = arith.constant 0 : index
    %0 = vector.load %arg1[%c0, %c0_0, %c0_1] : memref<1x16x512xbf16, #tpu.memory_space<vmem>>, vector<1x16x512xbf16>
    %1 = vector.shape_cast %0 : vector<1x16x512xbf16> to vector<16x512xbf16>
    %c0_2 = arith.constant 0 : index
    %c0_3 = arith.constant 0 : index
    %2 = vector.load %arg2[%c0_2, %c0_3] : memref<512x256xbf16, #tpu.memory_space<vmem>>, vector<512x256xbf16>
    %cst = arith.constant dense<0.000000e+00> : vector<16x256xf32>
    %3 = tpu.matmul %1, %2, %cst {dimension_numbers = #tpu.dot_dimension_numbers<[1], [0], [0], [1], [0, 0, 1, 1], [], []>} : vector<16x512xbf16>, vector<512x256xbf16>, vector<16x256xf32> -> vector<16x256xf32>
    %c0_4 = arith.constant 0 : index
    %c0_5 = arith.constant 0 : index
    %4 = vector.load %arg3[%c0_4, %c0_5] : memref<1x256xf32, #tpu.memory_space<vmem>>, vector<1x256xf32>
    %5 = vector.shape_cast %4 : vector<1x256xf32> to vector<256xf32>
    %6 = vector.shape_cast %5 : vector<256xf32> to vector<1x256xf32>
    %7 = vector.broadcast %6 : vector<1x256xf32> to vector<16x256xf32>
    %8 = arith.addf %3, %7 : vector<16x256xf32>
    %cst_6 = arith.constant 0.000000e+00 : f32
    %9 = vector.broadcast %cst_6 : f32 to vector<16x256xf32>
    %10 = arith.maximumf %8, %9 : vector<16x256xf32>
    %cst_7 = arith.constant 0.000000e+00 : f32
    %11 = vector.broadcast %cst_7 : f32 to vector<8x256xf32>
    %c0_8 = arith.constant 0 : index
    %c0_9 = arith.constant 0 : index
    %12 = vector.load %arg9[%c0_8, %c0_9] : memref<28x256xf32, #tpu.memory_space<vmem>>, vector<8x256xf32>
    tpu.vector_store %arg9[%c0_8, %c0_9], %11 {strides = array<i32>} : memref<28x256xf32, #tpu.memory_space<vmem>>, vector<8x256xf32>,
    %cst_10 = arith.constant 0.000000e+00 : f32
    %13 = vector.broadcast %cst_10 : f32 to vector<4x256xf32>
    %c24 = arith.constant 24 : index
    %c0_11 = arith.constant 0 : index
    %14 = vector.load %arg9[%c24, %c0_11] : memref<28x256xf32, #tpu.memory_space<vmem>>, vector<4x256xf32>
    tpu.vector_store %arg9[%c24, %c0_11], %13 {strides = array<i32>} : memref<28x256xf32, #tpu.memory_space<vmem>>, vector<4x256xf32>,
    %c8 = arith.constant 8 : index
    %c0_12 = arith.constant 0 : index
    %15 = vector.load %arg9[%c8, %c0_12] : memref<28x256xf32, #tpu.memory_space<vmem>>, vector<16x256xf32>
    tpu.vector_store %arg9[%c8, %c0_12], %10 {strides = array<i32>} : memref<28x256xf32, #tpu.memory_space<vmem>>, vector<16x256xf32>,
    %c5 = arith.constant 5 : index
    %c0_13 = arith.constant 0 : index
    %16 = vector.load %arg9[%c5, %c0_13] : memref<28x256xf32, #tpu.memory_space<vmem>>, vector<16x256xf32>
    %17 = arith.truncf %16 : vector<16x256xf32> to vector<16x256xbf16>
    %c0_14 = arith.constant 0 : index
    %c0_15 = arith.constant 0 : index
    %c0_16 = arith.constant 0 : index
    %18 = vector.load %arg4[%c0_14, %c0_15, %c0_16] : memref<8x256x128xbf16, #tpu.memory_space<vmem>>, vector<1x256x128xbf16>
    %19 = vector.shape_cast %18 : vector<1x256x128xbf16> to vector<256x128xbf16>
    %cst_17 = arith.constant dense<0.000000e+00> : vector<16x128xf32>
    %20 = tpu.matmul %17, %19, %cst_17 {dimension_numbers = #tpu.dot_dimension_numbers<[1], [0], [0], [1], [0, 0, 1, 1], [], []>} : vector<16x256xbf16>, vector<256x128xbf16>, vector<16x128xf32> -> vector<16x128xf32>
    %c6 = arith.constant 6 : index
    %c0_18 = arith.constant 0 : index
    %21 = vector.load %arg9[%c6, %c0_18] : memref<28x256xf32, #tpu.memory_space<vmem>>, vector<16x256xf32>
    %22 = arith.truncf %21 : vector<16x256xf32> to vector<16x256xbf16>
    %c1 = arith.constant 1 : index
    %c0_19 = arith.constant 0 : index
    %c0_20 = arith.constant 0 : index
    %23 = vector.load %arg4[%c1, %c0_19, %c0_20] : memref<8x256x128xbf16, #tpu.memory_space<vmem>>, vector<1x256x128xbf16>
    %24 = vector.shape_cast %23 : vector<1x256x128xbf16> to vector<256x128xbf16>
    %cst_21 = arith.constant dense<0.000000e+00> : vector<16x128xf32>
    %25 = tpu.matmul %22, %24, %cst_21 {dimension_numbers = #tpu.dot_dimension_numbers<[1], [0], [0], [1], [0, 0, 1, 1], [], []>} : vector<16x256xbf16>, vector<256x128xbf16>, vector<16x128xf32> -> vector<16x128xf32>
    %26 = arith.addf %20, %25 : vector<16x128xf32>
    %c7 = arith.constant 7 : index
    %c0_22 = arith.constant 0 : index
    %27 = vector.load %arg9[%c7, %c0_22] : memref<28x256xf32, #tpu.memory_space<vmem>>, vector<16x256xf32>
    %28 = arith.truncf %27 : vector<16x256xf32> to vector<16x256xbf16>
    %c2 = arith.constant 2 : index
    %c0_23 = arith.constant 0 : index
    %c0_24 = arith.constant 0 : index
    %29 = vector.load %arg4[%c2, %c0_23, %c0_24] : memref<8x256x128xbf16, #tpu.memory_space<vmem>>, vector<1x256x128xbf16>
    %30 = vector.shape_cast %29 : vector<1x256x128xbf16> to vector<256x128xbf16>
    %cst_25 = arith.constant dense<0.000000e+00> : vector<16x128xf32>
    %31 = tpu.matmul %28, %30, %cst_25 {dimension_numbers = #tpu.dot_dimension_numbers<[1], [0], [0], [1], [0, 0, 1, 1], [], []>} : vector<16x256xbf16>, vector<256x128xbf16>, vector<16x128xf32> -> vector<16x128xf32>
    %32 = arith.addf %26, %31 : vector<16x128xf32>
    %c8_26 = arith.constant 8 : index
    %c0_27 = arith.constant 0 : index
    %33 = vector.load %arg9[%c8_26, %c0_27] : memref<28x256xf32, #tpu.memory_space<vmem>>, vector<16x256xf32>
    %34 = arith.truncf %33 : vector<16x256xf32> to vector<16x256xbf16>
    %c3 = arith.constant 3 : index
    %c0_28 = arith.constant 0 : index
    %c0_29 = arith.constant 0 : index
    %35 = vector.load %arg4[%c3, %c0_28, %c0_29] : memref<8x256x128xbf16, #tpu.memory_space<vmem>>, vector<1x256x128xbf16>
    %36 = vector.shape_cast %35 : vector<1x256x128xbf16> to vector<256x128xbf16>
    %cst_30 = arith.constant dense<0.000000e+00> : vector<16x128xf32>
    %37 = tpu.matmul %34, %36, %cst_30 {dimension_numbers = #tpu.dot_dimension_numbers<[1], [0], [0], [1], [0, 0, 1, 1], [], []>} : vector<16x256xbf16>, vector<256x128xbf16>, vector<16x128xf32> -> vector<16x128xf32>
    %38 = arith.addf %32, %37 : vector<16x128xf32>
    %c9 = arith.constant 9 : index
    %c0_31 = arith.constant 0 : index
    %39 = vector.load %arg9[%c9, %c0_31] : memref<28x256xf32, #tpu.memory_space<vmem>>, vector<16x256xf32>
    %40 = arith.truncf %39 : vector<16x256xf32> to vector<16x256xbf16>
    %c4 = arith.constant 4 : index
    %c0_32 = arith.constant 0 : index
    %c0_33 = arith.constant 0 : index
    %41 = vector.load %arg4[%c4, %c0_32, %c0_33] : memref<8x256x128xbf16, #tpu.memory_space<vmem>>, vector<1x256x128xbf16>
    %42 = vector.shape_cast %41 : vector<1x256x128xbf16> to vector<256x128xbf16>
    %cst_34 = arith.constant dense<0.000000e+00> : vector<16x128xf32>
    %43 = tpu.matmul %40, %42, %cst_34 {dimension_numbers = #tpu.dot_dimension_numbers<[1], [0], [0], [1], [0, 0, 1, 1], [], []>} : vector<16x256xbf16>, vector<256x128xbf16>, vector<16x128xf32> -> vector<16x128xf32>
    %44 = arith.addf %38, %43 : vector<16x128xf32>
    %c10 = arith.constant 10 : index
    %c0_35 = arith.constant 0 : index
    %45 = vector.load %arg9[%c10, %c0_35] : memref<28x256xf32, #tpu.memory_space<vmem>>, vector<16x256xf32>
    %46 = arith.truncf %45 : vector<16x256xf32> to vector<16x256xbf16>
    %c5_36 = arith.constant 5 : index
    %c0_37 = arith.constant 0 : index
    %c0_38 = arith.constant 0 : index
    %47 = vector.load %arg4[%c5_36, %c0_37, %c0_38] : memref<8x256x128xbf16, #tpu.memory_space<vmem>>, vector<1x256x128xbf16>
    %48 = vector.shape_cast %47 : vector<1x256x128xbf16> to vector<256x128xbf16>
    %cst_39 = arith.constant dense<0.000000e+00> : vector<16x128xf32>
    %49 = tpu.matmul %46, %48, %cst_39 {dimension_numbers = #tpu.dot_dimension_numbers<[1], [0], [0], [1], [0, 0, 1, 1], [], []>} : vector<16x256xbf16>, vector<256x128xbf16>, vector<16x128xf32> -> vector<16x128xf32>
    %50 = arith.addf %44, %49 : vector<16x128xf32>
    %c11 = arith.constant 11 : index
    %c0_40 = arith.constant 0 : index
    %51 = vector.load %arg9[%c11, %c0_40] : memref<28x256xf32, #tpu.memory_space<vmem>>, vector<16x256xf32>
    %52 = arith.truncf %51 : vector<16x256xf32> to vector<16x256xbf16>
    %c6_41 = arith.constant 6 : index
    %c0_42 = arith.constant 0 : index
    %c0_43 = arith.constant 0 : index
    %53 = vector.load %arg4[%c6_41, %c0_42, %c0_43] : memref<8x256x128xbf16, #tpu.memory_space<vmem>>, vector<1x256x128xbf16>
    %54 = vector.shape_cast %53 : vector<1x256x128xbf16> to vector<256x128xbf16>
    %cst_44 = arith.constant dense<0.000000e+00> : vector<16x128xf32>
    %55 = tpu.matmul %52, %54, %cst_44 {dimension_numbers = #tpu.dot_dimension_numbers<[1], [0], [0], [1], [0, 0, 1, 1], [], []>} : vector<16x256xbf16>, vector<256x128xbf16>, vector<16x128xf32> -> vector<16x128xf32>
    %56 = arith.addf %50, %55 : vector<16x128xf32>
    %c12 = arith.constant 12 : index
    %c0_45 = arith.constant 0 : index
    %57 = vector.load %arg9[%c12, %c0_45] : memref<28x256xf32, #tpu.memory_space<vmem>>, vector<16x256xf32>
    %58 = arith.truncf %57 : vector<16x256xf32> to vector<16x256xbf16>
    %c7_46 = arith.constant 7 : index
    %c0_47 = arith.constant 0 : index
    %c0_48 = arith.constant 0 : index
    %59 = vector.load %arg4[%c7_46, %c0_47, %c0_48] : memref<8x256x128xbf16, #tpu.memory_space<vmem>>, vector<1x256x128xbf16>
    %60 = vector.shape_cast %59 : vector<1x256x128xbf16> to vector<256x128xbf16>
    %cst_49 = arith.constant dense<0.000000e+00> : vector<16x128xf32>
    %61 = tpu.matmul %58, %60, %cst_49 {dimension_numbers = #tpu.dot_dimension_numbers<[1], [0], [0], [1], [0, 0, 1, 1], [], []>} : vector<16x256xbf16>, vector<256x128xbf16>, vector<16x128xf32> -> vector<16x128xf32>
    %62 = arith.addf %56, %61 : vector<16x128xf32>
    %c0_50 = arith.constant 0 : index
    %c0_51 = arith.constant 0 : index
    %63 = vector.load %arg5[%c0_50, %c0_51] : memref<1x128xf32, #tpu.memory_space<vmem>>, vector<1x128xf32>
    %64 = vector.shape_cast %63 : vector<1x128xf32> to vector<128xf32>
    %65 = vector.shape_cast %64 : vector<128xf32> to vector<1x128xf32>
    %66 = vector.broadcast %65 : vector<1x128xf32> to vector<16x128xf32>
    %67 = arith.addf %62, %66 : vector<16x128xf32>
    %cst_52 = arith.constant 0.000000e+00 : f32
    %68 = vector.broadcast %cst_52 : f32 to vector<16x128xf32>
    %69 = arith.maximumf %67, %68 : vector<16x128xf32>
    %cst_53 = arith.constant 0.000000e+00 : f32
    %70 = vector.broadcast %cst_53 : f32 to vector<8x128xf32>
    %c0_54 = arith.constant 0 : index
    %c0_55 = arith.constant 0 : index
    %71 = vector.load %arg10[%c0_54, %c0_55] : memref<28x128xf32, #tpu.memory_space<vmem>>, vector<8x128xf32>
    tpu.vector_store %arg10[%c0_54, %c0_55], %70 {strides = array<i32>} : memref<28x128xf32, #tpu.memory_space<vmem>>, vector<8x128xf32>,
    %cst_56 = arith.constant 0.000000e+00 : f32
    %72 = vector.broadcast %cst_56 : f32 to vector<4x128xf32>
    %c24_57 = arith.constant 24 : index
    %c0_58 = arith.constant 0 : index
    %73 = vector.load %arg10[%c24_57, %c0_58] : memref<28x128xf32, #tpu.memory_space<vmem>>, vector<4x128xf32>
    tpu.vector_store %arg10[%c24_57, %c0_58], %72 {strides = array<i32>} : memref<28x128xf32, #tpu.memory_space<vmem>>, vector<4x128xf32>,
    %c8_59 = arith.constant 8 : index
    %c0_60 = arith.constant 0 : index
    %74 = vector.load %arg10[%c8_59, %c0_60] : memref<28x128xf32, #tpu.memory_space<vmem>>, vector<16x128xf32>
    tpu.vector_store %arg10[%c8_59, %c0_60], %69 {strides = array<i32>} : memref<28x128xf32, #tpu.memory_space<vmem>>, vector<16x128xf32>,
    %c5_61 = arith.constant 5 : index
    %c0_62 = arith.constant 0 : index
    %75 = vector.load %arg10[%c5_61, %c0_62] : memref<28x128xf32, #tpu.memory_space<vmem>>, vector<16x128xf32>
    %76 = arith.truncf %75 : vector<16x128xf32> to vector<16x128xbf16>
    %c0_63 = arith.constant 0 : index
    %c0_64 = arith.constant 0 : index
    %c0_65 = arith.constant 0 : index
    %77 = vector.load %arg6[%c0_63, %c0_64, %c0_65] : memref<8x128x128xbf16, #tpu.memory_space<vmem>>, vector<1x128x128xbf16>
    %78 = vector.shape_cast %77 : vector<1x128x128xbf16> to vector<128x128xbf16>
    %cst_66 = arith.constant dense<0.000000e+00> : vector<16x128xf32>
    %79 = tpu.matmul %76, %78, %cst_66 {dimension_numbers = #tpu.dot_dimension_numbers<[1], [0], [0], [1], [0, 0, 1, 1], [], []>} : vector<16x128xbf16>, vector<128x128xbf16>, vector<16x128xf32> -> vector<16x128xf32>
    %c6_67 = arith.constant 6 : index
    %c0_68 = arith.constant 0 : index
    %80 = vector.load %arg10[%c6_67, %c0_68] : memref<28x128xf32, #tpu.memory_space<vmem>>, vector<16x128xf32>
    %81 = arith.truncf %80 : vector<16x128xf32> to vector<16x128xbf16>
    %c1_69 = arith.constant 1 : index
    %c0_70 = arith.constant 0 : index
    %c0_71 = arith.constant 0 : index
    %82 = vector.load %arg6[%c1_69, %c0_70, %c0_71] : memref<8x128x128xbf16, #tpu.memory_space<vmem>>, vector<1x128x128xbf16>
    %83 = vector.shape_cast %82 : vector<1x128x128xbf16> to vector<128x128xbf16>
    %cst_72 = arith.constant dense<0.000000e+00> : vector<16x128xf32>
    %84 = tpu.matmul %81, %83, %cst_72 {dimension_numbers = #tpu.dot_dimension_numbers<[1], [0], [0], [1], [0, 0, 1, 1], [], []>} : vector<16x128xbf16>, vector<128x128xbf16>, vector<16x128xf32> -> vector<16x128xf32>
    %85 = arith.addf %79, %84 : vector<16x128xf32>
    %c7_73 = arith.constant 7 : index
    %c0_74 = arith.constant 0 : index
    %86 = vector.load %arg10[%c7_73, %c0_74] : memref<28x128xf32, #tpu.memory_space<vmem>>, vector<16x128xf32>
    %87 = arith.truncf %86 : vector<16x128xf32> to vector<16x128xbf16>
    %c2_75 = arith.constant 2 : index
    %c0_76 = arith.constant 0 : index
    %c0_77 = arith.constant 0 : index
    %88 = vector.load %arg6[%c2_75, %c0_76, %c0_77] : memref<8x128x128xbf16, #tpu.memory_space<vmem>>, vector<1x128x128xbf16>
    %89 = vector.shape_cast %88 : vector<1x128x128xbf16> to vector<128x128xbf16>
    %cst_78 = arith.constant dense<0.000000e+00> : vector<16x128xf32>
    %90 = tpu.matmul %87, %89, %cst_78 {dimension_numbers = #tpu.dot_dimension_numbers<[1], [0], [0], [1], [0, 0, 1, 1], [], []>} : vector<16x128xbf16>, vector<128x128xbf16>, vector<16x128xf32> -> vector<16x128xf32>
    %91 = arith.addf %85, %90 : vector<16x128xf32>
    %c8_79 = arith.constant 8 : index
    %c0_80 = arith.constant 0 : index
    %92 = vector.load %arg10[%c8_79, %c0_80] : memref<28x128xf32, #tpu.memory_space<vmem>>, vector<16x128xf32>
    %93 = arith.truncf %92 : vector<16x128xf32> to vector<16x128xbf16>
    %c3_81 = arith.constant 3 : index
    %c0_82 = arith.constant 0 : index
    %c0_83 = arith.constant 0 : index
    %94 = vector.load %arg6[%c3_81, %c0_82, %c0_83] : memref<8x128x128xbf16, #tpu.memory_space<vmem>>, vector<1x128x128xbf16>
    %95 = vector.shape_cast %94 : vector<1x128x128xbf16> to vector<128x128xbf16>
    %cst_84 = arith.constant dense<0.000000e+00> : vector<16x128xf32>
    %96 = tpu.matmul %93, %95, %cst_84 {dimension_numbers = #tpu.dot_dimension_numbers<[1], [0], [0], [1], [0, 0, 1, 1], [], []>} : vector<16x128xbf16>, vector<128x128xbf16>, vector<16x128xf32> -> vector<16x128xf32>
    %97 = arith.addf %91, %96 : vector<16x128xf32>
    %c9_85 = arith.constant 9 : index
    %c0_86 = arith.constant 0 : index
    %98 = vector.load %arg10[%c9_85, %c0_86] : memref<28x128xf32, #tpu.memory_space<vmem>>, vector<16x128xf32>
    %99 = arith.truncf %98 : vector<16x128xf32> to vector<16x128xbf16>
    %c4_87 = arith.constant 4 : index
    %c0_88 = arith.constant 0 : index
    %c0_89 = arith.constant 0 : index
    %100 = vector.load %arg6[%c4_87, %c0_88, %c0_89] : memref<8x128x128xbf16, #tpu.memory_space<vmem>>, vector<1x128x128xbf16>
    %101 = vector.shape_cast %100 : vector<1x128x128xbf16> to vector<128x128xbf16>
    %cst_90 = arith.constant dense<0.000000e+00> : vector<16x128xf32>
    %102 = tpu.matmul %99, %101, %cst_90 {dimension_numbers = #tpu.dot_dimension_numbers<[1], [0], [0], [1], [0, 0, 1, 1], [], []>} : vector<16x128xbf16>, vector<128x128xbf16>, vector<16x128xf32> -> vector<16x128xf32>
    %103 = arith.addf %97, %102 : vector<16x128xf32>
    %c10_91 = arith.constant 10 : index
    %c0_92 = arith.constant 0 : index
    %104 = vector.load %arg10[%c10_91, %c0_92] : memref<28x128xf32, #tpu.memory_space<vmem>>, vector<16x128xf32>
    %105 = arith.truncf %104 : vector<16x128xf32> to vector<16x128xbf16>
    %c5_93 = arith.constant 5 : index
    %c0_94 = arith.constant 0 : index
    %c0_95 = arith.constant 0 : index
    %106 = vector.load %arg6[%c5_93, %c0_94, %c0_95] : memref<8x128x128xbf16, #tpu.memory_space<vmem>>, vector<1x128x128xbf16>
    %107 = vector.shape_cast %106 : vector<1x128x128xbf16> to vector<128x128xbf16>
    %cst_96 = arith.constant dense<0.000000e+00> : vector<16x128xf32>
    %108 = tpu.matmul %105, %107, %cst_96 {dimension_numbers = #tpu.dot_dimension_numbers<[1], [0], [0], [1], [0, 0, 1, 1], [], []>} : vector<16x128xbf16>, vector<128x128xbf16>, vector<16x128xf32> -> vector<16x128xf32>
    %109 = arith.addf %103, %108 : vector<16x128xf32>
    %c11_97 = arith.constant 11 : index
    %c0_98 = arith.constant 0 : index
    %110 = vector.load %arg10[%c11_97, %c0_98] : memref<28x128xf32, #tpu.memory_space<vmem>>, vector<16x128xf32>
    %111 = arith.truncf %110 : vector<16x128xf32> to vector<16x128xbf16>
    %c6_99 = arith.constant 6 : index
    %c0_100 = arith.constant 0 : index
    %c0_101 = arith.constant 0 : index
    %112 = vector.load %arg6[%c6_99, %c0_100, %c0_101] : memref<8x128x128xbf16, #tpu.memory_space<vmem>>, vector<1x128x128xbf16>
    %113 = vector.shape_cast %112 : vector<1x128x128xbf16> to vector<128x128xbf16>
    %cst_102 = arith.constant dense<0.000000e+00> : vector<16x128xf32>
    %114 = tpu.matmul %111, %113, %cst_102 {dimension_numbers = #tpu.dot_dimension_numbers<[1], [0], [0], [1], [0, 0, 1, 1], [], []>} : vector<16x128xbf16>, vector<128x128xbf16>, vector<16x128xf32> -> vector<16x128xf32>
    %115 = arith.addf %109, %114 : vector<16x128xf32>
    %c12_103 = arith.constant 12 : index
    %c0_104 = arith.constant 0 : index
    %116 = vector.load %arg10[%c12_103, %c0_104] : memref<28x128xf32, #tpu.memory_space<vmem>>, vector<16x128xf32>
    %117 = arith.truncf %116 : vector<16x128xf32> to vector<16x128xbf16>
    %c7_105 = arith.constant 7 : index
    %c0_106 = arith.constant 0 : index
    %c0_107 = arith.constant 0 : index
    %118 = vector.load %arg6[%c7_105, %c0_106, %c0_107] : memref<8x128x128xbf16, #tpu.memory_space<vmem>>, vector<1x128x128xbf16>
    %119 = vector.shape_cast %118 : vector<1x128x128xbf16> to vector<128x128xbf16>
    %cst_108 = arith.constant dense<0.000000e+00> : vector<16x128xf32>
    %120 = tpu.matmul %117, %119, %cst_108 {dimension_numbers = #tpu.dot_dimension_numbers<[1], [0], [0], [1], [0, 0, 1, 1], [], []>} : vector<16x128xbf16>, vector<128x128xbf16>, vector<16x128xf32> -> vector<16x128xf32>
    %121 = arith.addf %115, %120 : vector<16x128xf32>
    %c0_109 = arith.constant 0 : index
    %c0_110 = arith.constant 0 : index
    %122 = vector.load %arg7[%c0_109, %c0_110] : memref<1x128xf32, #tpu.memory_space<vmem>>, vector<1x128xf32>
    %123 = vector.shape_cast %122 : vector<1x128xf32> to vector<128xf32>
    %124 = vector.shape_cast %123 : vector<128xf32> to vector<1x128xf32>
    %125 = vector.broadcast %124 : vector<1x128xf32> to vector<16x128xf32>
    %126 = arith.addf %121, %125 : vector<16x128xf32>
    %cst_111 = arith.constant 0.000000e+00 : f32
    %127 = vector.broadcast %cst_111 : f32 to vector<16x128xf32>
    %128 = arith.maximumf %126, %127 : vector<16x128xf32>
    %129 = tpu.transpose %128, [1, 0] : vector<16x128xf32> -> vector<128x16xf32>
    %130 = vector.extract_strided_slice %129 {offsets = [0, 0], sizes = [32, 16], strides = [1, 1]} : vector<128x16xf32> to vector<32x16xf32>
    %c0_112 = arith.constant 0 : index
    %c0_113 = arith.constant 0 : index
    %c0_114 = arith.constant 0 : index
    %131 = vector.load %arg8[%c0_112, %c0_113, %c0_114] : memref<1x32x16xf32, #tpu.memory_space<vmem>>, vector<1x32x16xf32>
    %132 = vector.shape_cast %131 : vector<1x32x16xf32> to vector<32x16xf32>
    %133 = vector.shape_cast %130 : vector<32x16xf32> to vector<1x32x16xf32>
    tpu.vector_store %arg8[%c0_112, %c0_113, %c0_114], %133 {strides = array<i32>} : memref<1x32x16xf32, #tpu.memory_space<vmem>>, vector<1x32x16xf32>,
    return
  }
  func.func @transform_0(%arg0: i32) -> (i32, i32, i32) {
    %c0_i32 = arith.constant 0 : i32
    %c0_i32_0 = arith.constant 0 : i32
    %c0_i32_1 = arith.constant 0 : i32
    return %arg0, %c0_i32, %c0_i32_0 : i32, i32, i32
  }
  func.func @transform_1(%arg0: i32) -> (i32, i32) {
    %c0_i32 = arith.constant 0 : i32
    %c0_i32_0 = arith.constant 0 : i32
    %c0_i32_1 = arith.constant 0 : i32
    return %c0_i32, %c0_i32_0 : i32, i32
  }
  func.func @transform_2(%arg0: i32) -> (i32, i32) {
    %c0_i32 = arith.constant 0 : i32
    %c0_i32_0 = arith.constant 0 : i32
    %c0_i32_1 = arith.constant 0 : i32
    return %c0_i32, %c0_i32_0 : i32, i32
  }
  func.func @transform_3(%arg0: i32) -> (i32, i32, i32) {
    %c0_i32 = arith.constant 0 : i32
    %c0_i32_0 = arith.constant 0 : i32
    %c0_i32_1 = arith.constant 0 : i32
    %c0_i32_2 = arith.constant 0 : i32
    return %c0_i32, %c0_i32_0, %c0_i32_1 : i32, i32, i32
  }
  func.func @transform_4(%arg0: i32) -> (i32, i32) {
    %c0_i32 = arith.constant 0 : i32
    %c0_i32_0 = arith.constant 0 : i32
    %c0_i32_1 = arith.constant 0 : i32
    return %c0_i32, %c0_i32_0 : i32, i32
  }
  func.func @transform_5(%arg0: i32) -> (i32, i32, i32) {
    %c0_i32 = arith.constant 0 : i32
    %c0_i32_0 = arith.constant 0 : i32
    %c0_i32_1 = arith.constant 0 : i32
    %c0_i32_2 = arith.constant 0 : i32
    return %c0_i32, %c0_i32_0, %c0_i32_1 : i32, i32, i32
  }
  func.func @transform_6(%arg0: i32) -> (i32, i32) {
    %c0_i32 = arith.constant 0 : i32
    %c0_i32_0 = arith.constant 0 : i32
    %c0_i32_1 = arith.constant 0 : i32
    return %c0_i32, %c0_i32_0 : i32, i32
  }
  func.func @transform_7(%arg0: i32) -> (i32, i32, i32) {
    %c0_i32 = arith.constant 0 : i32
    %c0_i32_0 = arith.constant 0 : i32
    %c0_i32_1 = arith.constant 0 : i32
    return %arg0, %c0_i32, %c0_i32_0 : i32, i32, i32
  }
}

</mosaic_0001>

<bundles_post_ra>
// kernel: forward.1
= control target key start
LH: loop header
LB: loop body
LE: loop exit
PB: predicated region body
PF: predicated region fallthrough
CT: control target
= control target key end

     0   :  { %12 = vsyncpa [#allocation5], 0  ;;  %s4758_s24 = smov 0   ;;  %s5571_s0 = inlined_call_operand.vmem [shape: bf16[2,16,512], index: 0, kind: input, shape index: {}]   ;;  %s5572_s1 = inlined_call_operand.vmem [shape: bf16[512,256], index: 1, kind: input, shape index: {}]   ;;  %s5573_s2 = inlined_call_operand.vmem [shape: f32[1,256], index: 2, kind: input, shape index: {}]   ;;  %s5574_s3 = inlined_call_operand.vmem [shape: bf16[8,256,128], index: 3, kind: input, shape index: {}]   ;;  %s5575_s4 = inlined_call_operand.vmem [shape: f32[1,128], index: 4, kind: input, shape index: {}]   ;;  %s5576_s5 = inlined_call_operand.hbm [shape: bf16[8,128,128], index: 5, kind: input, shape index: {}]   ;;  %s5577_s6 = inlined_call_operand.vmem [shape: f32[1,128], index: 6, kind: input, shape index: {}]   ;;  %s5578_s7 = inlined_call_operand.vmem [shape: f32[2,32,16], index: 7, kind: output, shape index: {}]  }
   0x1 LB: > { %s4764_s25 = sadd.s32 4294967295, %s4711_s24   ;;  %p3440_p0 = scmp.ge.s32.totalorder %s4711_s24, 1  ;;  %s4711_s24 = sphi %s4758_s24, %s18_s24  }
   0x2   : > { %p201_p1 = scmp.lt.s32.totalorder %s4711_s24, 3  ;;  %s4713_s26 = smov [#allocation4]  }
   0x3   : > { %s225_s27 = sshll.u32 %s4713_s26, 4  ;;  %p5579_p3 = scmp.eq.s32.totalorder %s4764_s25, 0  ;;  %s226_s27 = int_to_ptr.vmem [resolvable:$true] %s225_s27 }
   0x4   : > { %p4768_p2 = pnand %p3440_p0, %p201_p1  ;;  %s4673_s9 = scalar_lea.hbm %s5576_s5, 8192 }
   0x5   : > { %p4674_p6 = scmp.ne.s32.totalorder %s5576_s5, %s4673_s9  ;;  %p4680_p10 = scmp.lt.u32.totalorder %s4673_s9, %s5576_s5 }
   0x6   : > { %s5581_s28 = scalar_select %p4768_p2, 1, 0 }
   0x7   : > { %p4359_p4 = pneg %p4768_p2 }
   0x9   : > { %p4777_p5 = pnand %p5579_p3, %p4359_p4 }
   0xb   : > { %p4675_p7 = pneg %p4777_p5 }
   0xd   : > { %p4676_p8 = pnand %p4675_p7, %p4674_p6 }
   0xf   : > { %p4677_p9 = pneg %p4676_p8 }
  0x11   : > { %p4682_p11 = pnand %p4680_p10, %p4677_p9 }
  0x13   : > { %4685 = shalt.err (!%p4682_p11)
}
  0x14   : > { %s4686_s14 = scalar_lea.vmem %s226_s27, 8192  ;;  %p4694_p1 = scmp.lt.s32.totalorder %s226_s27, %s226_s27 }
  0x15   : > { %p4687_p12 = scmp.ne.s32.totalorder %s226_s27, %s4686_s14  ;;  %p4695_p4 = scmp.lt.s32.totalorder %s4686_s14, %s4686_s14 }
  0x17   : > { %p4689_p13 = pnand %p4687_p12, %p4675_p7  ;;  %p4696_p3 = por %p4695_p4, %p4694_p1 }
  0x19   : > { %p4690_p0 = pneg %p4689_p13 }
  0x1b   : > { %p4697_p2 = pnand %p4696_p3, %p4690_p0 }
  0x1d   : > { %4700 = shalt.err (!%p4697_p2)
}
  0x1e   : > { %s4714_s15 = smov 64   ;;  %s4715_s16 = smov 4  }
  0x1f   : > { %4362 = dma.hbm_to_vmem [thread:$0]  (!%p4777_p5), %s5576_s5, 8192, %s226_s27, [#allocation5], %s4714_s15, %s4714_s15, %s4715_s16  }
  0x20   : > { %p5583_p6 = scmp.ne.s32.totalorder %s5581_s28, 0 }
  0x21   : > { %p5584_p8 = scmp.eq.s32.totalorder (!%p5583_p6), %s4764_s25, 0 }
  0x22   : > { %252 = sbr.rel (%p5583_p6) target bundleno = 1255 (0x4e7), region = 48 }
  0x29   : > { %4706 = dma.done.wait (%p5584_p8), [#allocation5], 8192   ;;  %p5585_p7 = pmov %p5584_p8 }
  0x2a   : > { %v4378_v0 = vld [vmem:[%s5572_s1 + $0x4] ss:$8 sps:$4 sm:$0xff]   ;;  %v4380_v1 = vld [vmem:[%s5572_s1] ss:$8 sps:$4 sm:$0xff]   ;;  %v4381_v2 = vld [vmem:[%s5572_s1 + $0x14] ss:$8 sps:$4 sm:$0xff]  }
  0x2b   : > { %4708 = vsyncadd (%p5585_p7), [#allocation5], 4294959104  ;;  %715 = vmatprep.subr.bf16.mxu0 %v4378_v0  ;;  %v4383_v3 = vld [vmem:[%s5572_s1 + $0x10] ss:$8 sps:$4 sm:$0xff]   ;;  %v4384_v4 = vld [vmem:[%s5572_s1 + $0x24] ss:$8 sps:$4 sm:$0xff]  }
  0x2c   : > { %716 = vmatpush1.bf16.msra.mxu0 %v4380_v1  ;;  %v4386_v5 = vld [vmem:[%s5572_s1 + $0x20] ss:$8 sps:$4 sm:$0xff]   ;;  %v4387_v6 = vld [vmem:[%s5572_s1 + $0x34] ss:$8 sps:$4 sm:$0xff]   ;;  %p284_p2 = scmp.lt.s32.totalorder %s4764_s25, 1  ;;  %vm900_vm0 = vcmask 1044480  }
  0x2d   : > { %717 = vmatprep.subr.bf16.mxu0 %v4381_v2  ;;  %v4389_v7 = vld [vmem:[%s5572_s1 + $0x30] ss:$8 sps:$4 sm:$0xff]   ;;  %v4390_v8 = vld [vmem:[%s5572_s1 + $0x44] ss:$8 sps:$4 sm:$0xff]   ;;  %v4392_v9 = vld [vmem:[%s5572_s1 + $0x40] ss:$8 sps:$4 sm:$0xff]  }
  0x2e   : > { %s5587_s25 = smov (!%p284_p2, %s4764_s25), 1  ;;  %v4393_v10 = vld [vmem:[%s5572_s1 + $0x54] ss:$8 sps:$4 sm:$0xff]   ;;  %v4395_v11 = vld [vmem:[%s5572_s1 + $0x50] ss:$8 sps:$4 sm:$0xff]   ;;  %v4480_v28 = vld [vmem:[%s5574_s3 + $0xc0] sm:$0xff]  }
  0x2f   : > { %s3937_s20 = sshll.u32 %s5587_s25, 5  ;;  %v4396_v12 = vld [vmem:[%s5572_s1 + $0x64] ss:$8 sps:$4 sm:$0xff]   ;;  %v4398_v14 = vld [vmem:[%s5572_s1 + $0x60] ss:$8 sps:$4 sm:$0xff]   ;;  %3939 = vmatprep.subr.bf16.mxu1 %v4480_v28  ;;  %v4486_v34 = vld [vmem:[%s5574_s3 + $0xd0] sm:$0xff]  }
  0x30   : > { %718 = vmatpush1.bf16.msra.mxu0 %v4383_v3  ;;  %s4849_s27 = scalar_lea.vmem %s5571_s0, %s3937_s20  ;;  %v4399_v15 = vld [vmem:[%s5572_s1 + $0x74] ss:$8 sps:$4 sm:$0xff]   ;;  %v4401_v16 = vld [vmem:[%s5572_s1 + $0x70] ss:$8 sps:$4 sm:$0xff]   ;;  %v4402_v17 = vld [vmem:[%s5572_s1 + $0x84] ss:$8 sps:$4 sm:$0xff]   ;;  %s293_s18 = scalar_lea.vmem %s5578_s7, %s3937_s20 }
  0x31   : > { %719 = vmatprep.subr.bf16.mxu0 %v4384_v4  ;;  %v4428_v13 = vld [vmem:[%s4849_s27 + $0x4] ss:$16 sps:$4 sm:$0xff]   ;;  %v4404_v18 = vld [vmem:[%s5572_s1 + $0x80] ss:$8 sps:$4 sm:$0xff]   ;;  %v4407_v20 = vld [vmem:[%s5572_s1 + $0x90] ss:$8 sps:$4 sm:$0xff]  }
  0x32   : > { %747 = vmatprep.mubr.bf16.mxu0 %v4428_v13  ;;  %v4405_v19 = vld [vmem:[%s5572_s1 + $0x94] ss:$8 sps:$4 sm:$0xff]   ;;  %v4408_v21 = vld [vmem:[%s5572_s1 + $0xa4] ss:$8 sps:$4 sm:$0xff]   ;;  %v4410_v22 = vld [vmem:[%s5572_s1 + $0xa0] ss:$8 sps:$4 sm:$0xff]  }
  0x33   : > { %v4411_v23 = vld [vmem:[%s5572_s1 + $0xb4] ss:$8 sps:$4 sm:$0xff]   ;;  %v4413_v24 = vld [vmem:[%s5572_s1 + $0xb0] ss:$8 sps:$4 sm:$0xff]   ;;  %v4414_v25 = vld [vmem:[%s5572_s1 + $0xc4] ss:$8 sps:$4 sm:$0xff]  }
  0x34   : > { %720 = vmatpush1.bf16.msra.mxu0 %v4386_v5  ;;  %v4416_v26 = vld [vmem:[%s5572_s1 + $0xc0] ss:$8 sps:$4 sm:$0xff]   ;;  %v4417_v27 = vld [vmem:[%s5572_s1 + $0xd4] ss:$8 sps:$4 sm:$0xff]   ;;  %v4419_v31 = vld [vmem:[%s5572_s1 + $0xd0] ss:$8 sps:$4 sm:$0xff]  }
  0x35   : > { %721 = vmatprep.subr.bf16.mxu0 %v4387_v6  ;;  %v4481_v29 = vld [vmem:[%s5574_s3 + $0x80] sm:$0xff]   ;;  %v4482_v30 = vld [vmem:[%s5574_s3 + $0xc8] sm:$0xff]   ;;  %v4488_v35 = vld [vmem:[%s5574_s3 + $0x90] sm:$0xff]   ;;  %vm1656_vm1 = vsmask.f32 7424  ;;  %vm1867_vm5 = vcmask 1046528  }
  0x36   : > { %3940 = vmatpush3.bf16.msra.mxu1 %v4481_v29  ;;  %v4484_v32 = vld [vmem:[%s5574_s3 + $0x88] sm:$0xff]   ;;  %v4423_v37 = vld [vmem:[%s5572_s1 + $0xf4] ss:$8 sps:$4 sm:$0xff]   ;;  %v4425_v38 = vld [vmem:[%s5572_s1 + $0xf0] ss:$8 sps:$4 sm:$0xff]   ;;  %vm2277_vm6 = vcmask 1045504  }
  0x37   : > { %3941 = vmatprep.subr.bf16.mxu1 %v4482_v30  ;;  %v4420_v33 = vld [vmem:[%s5572_s1 + $0xe4] ss:$8 sps:$4 sm:$0xff]   ;;  %v4422_v36 = vld [vmem:[%s5572_s1 + $0xe0] ss:$8 sps:$4 sm:$0xff]   ;;  %v4434_v43 = vld [vmem:[%s5572_s1 + $0x114] ss:$8 sps:$4 sm:$0xff]  }
  0x38   : > { %722 = vmatpush1.bf16.msra.mxu0 %v4389_v7  ;;  %v4431_v39 = vld [vmem:[%s5572_s1 + $0x104] ss:$8 sps:$4 sm:$0xff]   ;;  %v4426_v40 = vld [vmem:[%s4849_s27] ss:$16 sps:$4 sm:$0xff]   ;;  %v4440_v47 = vld [vmem:[%s5572_s1 + $0x134] ss:$8 sps:$4 sm:$0xff]  }
  0x39   : > { %723 = vmatprep.subr.bf16.mxu0 %v4390_v8  ;;  %v4429_v41 = vld [vmem:[%s5572_s1 + $0x100] ss:$8 sps:$4 sm:$0xff]   ;;  %v4479_v42 = vld [vmem:[%s4849_s27 + $0xc] ss:$16 sps:$4 sm:$0xff]   ;;  %v4432_v44 = vld [vmem:[%s5572_s1 + $0x110] ss:$8 sps:$4 sm:$0xff]  }
  0x3a   : > { %3942 = vmatpush3.bf16.msra.mxu1 %v4484_v32  ;;  %v4437_v45 = vld [vmem:[%s5572_s1 + $0x124] ss:$8 sps:$4 sm:$0xff]   ;;  %v4435_v46 = vld [vmem:[%s5572_s1 + $0x120] ss:$8 sps:$4 sm:$0xff]   ;;  %v4438_v48 = vld [vmem:[%s5572_s1 + $0x130] ss:$8 sps:$4 sm:$0xff]  }
  0x3b   : > { %3943 = vmatprep.subr.bf16.mxu1 %v4486_v34  ;;  %v4443_v49 = vld [vmem:[%s5572_s1 + $0x144] ss:$8 sps:$4 sm:$0xff]   ;;  %v4441_v50 = vld [vmem:[%s5572_s1 + $0x140] ss:$8 sps:$4 sm:$0xff]   ;;  %v4446_v51 = vld [vmem:[%s5572_s1 + $0x154] ss:$8 sps:$4 sm:$0xff]  }
  0x3c   : > { %724 = vmatpush1.bf16.msra.mxu0 %v4392_v9  ;;  %v4444_v52 = vld [vmem:[%s5572_s1 + $0x150] ss:$8 sps:$4 sm:$0xff]   ;;  %v4449_v53 = vld [vmem:[%s5572_s1 + $0x164] ss:$8 sps:$4 sm:$0xff]   ;;  %v4447_v54 = vld [vmem:[%s5572_s1 + $0x160] ss:$8 sps:$4 sm:$0xff]  }
  0x3d   : > { %725 = vmatprep.subr.bf16.mxu0 %v4393_v10  ;;  %v4452_v55 = vld [vmem:[%s5572_s1 + $0x174] ss:$8 sps:$4 sm:$0xff]   ;;  %v4450_v56 = vld [vmem:[%s5572_s1 + $0x170] ss:$8 sps:$4 sm:$0xff]   ;;  %v4455_v57 = vld [vmem:[%s5572_s1 + $0x184] ss:$8 sps:$4 sm:$0xff]  }
  0x3e   : > { %3944 = vmatpush3.bf16.msra.mxu1 %v4488_v35  ;;  %v4453_v58 = vld [vmem:[%s5572_s1 + $0x180] ss:$8 sps:$4 sm:$0xff]   ;;  %v4458_v59 = vld [vmem:[%s5572_s1 + $0x194] ss:$8 sps:$4 sm:$0xff]   ;;  %v4456_v60 = vld [vmem:[%s5572_s1 + $0x190] ss:$8 sps:$4 sm:$0xff]  }
  0x3f   : > { %v4461_v61 = vld [vmem:[%s5572_s1 + $0x1a4] ss:$8 sps:$4 sm:$0xff]   ;;  %v4459_v62 = vld [vmem:[%s5572_s1 + $0x1a0] ss:$8 sps:$4 sm:$0xff]   ;;  %v4464_v63 = vld [vmem:[%s5572_s1 + $0x1b4] ss:$8 sps:$4 sm:$0xff]  }
  0x40   : > { %726 = vmatpush1.bf16.msra.mxu0 %v4395_v11  ;;  %v4462_v0 = vld [vmem:[%s5572_s1 + $0x1b0] ss:$8 sps:$4 sm:$0xff]   ;;  %v4467_v1 = vld [vmem:[%s5572_s1 + $0x1c4] ss:$8 sps:$4 sm:$0xff]   ;;  %v4465_v2 = vld [vmem:[%s5572_s1 + $0x1c0] ss:$8 sps:$4 sm:$0xff]  }
  0x41   : > { %727 = vmatprep.subr.bf16.mxu0 %v4396_v12  ;;  %v4470_v3 = vld [vmem:[%s5572_s1 + $0x1d4] ss:$8 sps:$4 sm:$0xff]   ;;  %v4468_v4 = vld [vmem:[%s5572_s1 + $0x1d0] ss:$8 sps:$4 sm:$0xff]   ;;  %v4473_v5 = vld [vmem:[%s5572_s1 + $0x1e4] ss:$8 sps:$4 sm:$0xff]  }
  0x42   : > { %v4471_v6 = vld [vmem:[%s5572_s1 + $0x1e0] ss:$8 sps:$4 sm:$0xff]   ;;  %v4476_v7 = vld [vmem:[%s5572_s1 + $0x1f4] ss:$8 sps:$4 sm:$0xff]   ;;  %v4474_v8 = vld [vmem:[%s5572_s1 + $0x1f0] ss:$8 sps:$4 sm:$0xff]  }
  0x43   : > { %v4483_v9 = vld [vmem:[%s5574_s3 + $0x240] sm:$0xff]   ;;  %v4477_v10 = vld [vmem:[%s4849_s27 + $0x8] ss:$16 sps:$4 sm:$0xff]   ;;  %v4504_v30 = vld [vmem:[%s5574_s3 + $0xb0] sm:$0xff]   ;;  %vm1046_vm2 = vsmask.f32 5376 }
  0x44   : > { %728 = vmatpush1.bf16.msra.mxu0 %v4398_v14  ;;  %v4485_v11 = vld [vmem:[%s5574_s3 + $0x200] sm:$0xff]   ;;  %v4487_v12 = vld [vmem:[%s5574_s3 + $0x248] sm:$0xff]   ;;  %v4491_v14 = vld [vmem:[%s5574_s3 + $0x250] sm:$0xff]   ;;  %vm2056_vm3 = vsmask.f32 6400  ;;  %vm4717_vm7 = vmmov 0  }
  0x45   : > { %729 = vmatprep.subr.bf16.mxu0 %v4399_v15  ;;  %v4489_v13 = vld [vmem:[%s5574_s3 + $0x208] sm:$0xff]   ;;  %v4716_v15 = vmov 0.0   ;;  %v4506_v32 = vld [vmem:[%s5574_s3 + $0xf8] sm:$0xff]   ;;  %vm1261_vm4 = vsmask.f32 4352  ;;  %vm3366_vm8 = vcmask 130048  }
  0x46   : > { %806 = vst [vmem:[#allocation2 + $0x8] sm:$0xff] %v4716_v15  ;;  %805 = vst [vmem:[#allocation2] sm:$0xff] %v4716_v15  ;;  %v4503_v28 = vld [vmem:[%s5574_s3 + $0x268] sm:$0xff]   ;;  %v4508_v34 = vld [vmem:[%s5574_s3 + $0xb8] sm:$0xff]  }
  0x47   : > { %807 = vst [vmem:[#allocation2 + $0x30] sm:$0xf] %v4716_v15  ;;  %808 = vst [vmem:[#allocation2 + $0x38] sm:$0xf] %v4716_v15  ;;  %v4505_v29 = vld [vmem:[%s5574_s3 + $0x228] sm:$0xff]   ;;  %v4511_v35 = vld [vmem:[%s5574_s3 + $0x278] sm:$0xff]  }
  0x48   : > { %730 = vmatpush1.bf16.msra.mxu0 %v4401_v16  ;;  %2436 = vst [vmem:[#allocation3] sm:$0xff] %v4716_v15  ;;  %2437 = vst [vmem:[#allocation3 + $0x18] sm:$0xf] %v4716_v15  ;;  %v4493_v16 = vld [vmem:[%s5574_s3 + $0x210] sm:$0xff]  }
  0x49   : > { %731 = vmatprep.subr.bf16.mxu0 %v4402_v17  ;;  %v4490_v17 = vld [vmem:[%s5574_s3 + $0xd8] sm:$0xff]  }
  0x4a   : > { %3945 = vmatprep.subr.bf16.mxu1 %v4490_v17 }
  0x4c   : > { %732 = vmatpush1.bf16.msra.mxu0 %v4404_v18  ;;  %v4492_v18 = vld [vmem:[%s5574_s3 + $0x98] sm:$0xff]  }
  0x4d   : > { %733 = vmatprep.subr.bf16.mxu0 %v4405_v19  ;;  %v4495_v19 = vld [vmem:[%s5574_s3 + $0x258] sm:$0xff]   ;;  %3946 = vmatpush3.bf16.msra.mxu1 %v4492_v18 }
  0x50   : > { %734 = vmatpush1.bf16.msra.mxu0 %v4407_v20  ;;  %v4497_v20 = vld [vmem:[%s5574_s3 + $0x218] sm:$0xff]  }
  0x51   : > { %735 = vmatprep.subr.bf16.mxu0 %v4408_v21  ;;  %v4494_v21 = vld [vmem:[%s5574_s3 + $0xe0] sm:$0xff]  }
  0x52   : > { %3947 = vmatprep.subr.bf16.mxu1 %v4494_v21 }
  0x54   : > { %736 = vmatpush1.bf16.msra.mxu0 %v4410_v22  ;;  %v4496_v22 = vld [vmem:[%s5574_s3 + $0xa0] sm:$0xff]  }
  0x55   : > { %737 = vmatprep.subr.bf16.mxu0 %v4411_v23  ;;  %v4499_v23 = vld [vmem:[%s5574_s3 + $0x260] sm:$0xff]   ;;  %3948 = vmatpush3.bf16.msra.mxu1 %v4496_v22 }
  0x58   : > { %738 = vmatpush1.bf16.msra.mxu0 %v4413_v24  ;;  %v4501_v24 = vld [vmem:[%s5574_s3 + $0x220] sm:$0xff]  }
  0x59   : > { %739 = vmatprep.subr.bf16.mxu0 %v4414_v25  ;;  %v4498_v25 = vld [vmem:[%s5574_s3 + $0xe8] sm:$0xff]  }
  0x5a   : > { %3949 = vmatprep.subr.bf16.mxu1 %v4498_v25 }
  0x5c   : > { %740 = vmatpush1.bf16.msra.mxu0 %v4416_v26  ;;  %v4500_v26 = vld [vmem:[%s5574_s3 + $0xa8] sm:$0xff]  }
  0x5d   : > { %741 = vmatprep.subr.bf16.mxu0 %v4417_v27  ;;  %v4502_v27 = vld [vmem:[%s5574_s3 + $0xf0] sm:$0xff]   ;;  %3950 = vmatpush3.bf16.msra.mxu1 %v4500_v26 }
  0x5e   : > { %3951 = vmatprep.subr.bf16.mxu1 %v4502_v27 }
  0x60   : > { %742 = vmatpush1.bf16.msra.mxu0 %v4419_v31  ;;  %v4507_v31 = vld [vmem:[%s5574_s3 + $0x270] sm:$0xff]  }
  0x61   : > { %743 = vmatprep.subr.bf16.mxu0 %v4420_v33  ;;  %v4509_v33 = vld [vmem:[%s5574_s3 + $0x230] sm:$0xff]   ;;  %3952 = vmatpush3.bf16.msra.mxu1 %v4504_v30 }
  0x62   : > { %3953 = vmatprep.subr.bf16.mxu1 %v4506_v32 }
  0x64   : > { %744 = vmatpush1.bf16.msra.mxu0 %v4422_v36  ;;  %v4510_v36 = vld [vmem:[%s5574_s3 + $0x40] sm:$0xff]  }
  0x65   : > { %745 = vmatprep.subr.bf16.mxu0 %v4423_v37  ;;  %3954 = vmatpush3.bf16.msra.mxu1 %v4508_v34  ;;  %v4513_v37 = vld [vmem:[%s5574_s3 + $0x238] sm:$0xff]  }
  0x66   : > { %3961 = vmatprep.subr.bf16.mxu1 %v4510_v36 }
  0x68   : > { %746 = vmatpush1.bf16.msra.mxu0 %v4425_v38  ;;  %v4515_v38 = vld [vmem:[%s5574_s3 + $0x340] sm:$0xff]  }
  0x69   : > { %758 = vmatprep.subr.bf16.mxu0 %v4431_v39  ;;  %v365_v39 = vlaneseq }
  0x6b   : > { %748 = vmatmul.mubr.bf16.vlgmr.msra.gmra.mrb[0].mxu0 %v4426_v40  ;;  %v366_v40 = vshrl.u32 %v365_v39, 7 }
  0x6c   : > { %759 = vmatpush1.bf16.msra.mxu0 %v4429_v41  ;;  %790 = vmatprep.mubr.bf16.mxu0 %v4479_v42  ;;  %v363_v42 = vld [vmem:[%s5573_s2] sm:$0x3] }
  0x6d   : > { %760 = vmatprep.subr.bf16.mxu0 %v4434_v43  ;;  %v367_v41 = vsub.s32 0, %v366_v40  ;;  %v371_v43 = vsub.s32 1, %v366_v40 }
  0x70   : > { %761 = vmatpush1.bf16.msra.mxu0 %v4432_v44  ;;  %v368_v44 = vrot.slane %v363_v42, %v367_v41 }
  0x71   : > { %762 = vmatprep.subr.bf16.mxu0 %v4437_v45  ;;  %v372_v45 = vrot.slane %v363_v42, %v371_v43 }
  0x74   : > { %763 = vmatpush1.bf16.msra.mxu0 %v4435_v46 }
  0x75   : > { %764 = vmatprep.subr.bf16.mxu0 %v4440_v47  ;;  %v2018_v47 = vld [vmem:[#allocation2 + $0x38] sm:$0x7] }
  0x78   : > { %765 = vmatpush1.bf16.msra.mxu0 %v4438_v48 }
  0x79   : > { %766 = vmatprep.subr.bf16.mxu0 %v4443_v49 }
  0x7c   : > { %767 = vmatpush1.bf16.msra.mxu0 %v4441_v50  ;;  %v1617_v50 = vld [vmem:[#allocation2 + $0x30] sm:$0x1] }
  0x7d   : > { %768 = vmatprep.subr.bf16.mxu0 %v4446_v51 }
  0x80   : > { %769 = vmatpush1.bf16.msra.mxu0 %v4444_v52 }
  0x81   : > { %770 = vmatprep.subr.bf16.mxu0 %v4449_v53  ;;  %v1618_v53 = vld [vmem:[#allocation2 + $0x38] sm:$0x1] }
  0x84   : > { %771 = vmatpush1.bf16.msra.mxu0 %v4447_v54 }
  0x85   : > { %772 = vmatprep.subr.bf16.mxu0 %v4452_v55 }
  0x88   : > { %773 = vmatpush1.bf16.msra.mxu0 %v4450_v56 }
  0x89   : > { %774 = vmatprep.subr.bf16.mxu0 %v4455_v57  ;;  %v814_v57 = vld [vmem:[#allocation2 + $0x8] sm:$0xe0] }
  0x8c   : > { %775 = vmatpush1.bf16.msra.mxu0 %v4453_v58  ;;  %v2022_v58 = vpack.c.bf16 %v2018_v47, %v2018_v47  ;;  %v4512_v47 = vld [vmem:[%s5574_s3] sm:$0xff]  }
  0x8d   : > { %776 = vmatprep.subr.bf16.mxu0 %v4458_v59 }
  0x90   : > { %777 = vmatpush1.bf16.msra.mxu0 %v4456_v60 }
  0x91   : > { %778 = vmatprep.subr.bf16.mxu0 %v4461_v61  ;;  %v1621_v61 = vpack.c.bf16 %v1617_v50, %v1617_v50 }
  0x94   : > { %779 = vmatpush1.bf16.msra.mxu0 %v4459_v62 }
  0x95   : > { %780 = vmatprep.subr.bf16.mxu0 %v4464_v63  ;;  %v1622_v63 = vpack.c.bf16 %v1618_v53, %v1618_v53 }
  0x98   : > { %781 = vmatpush1.bf16.msra.mxu0 %v4462_v0 }
  0x99   : > { %782 = vmatprep.subr.bf16.mxu0 %v4467_v1  ;;  %v856_v1 = vld [vmem:[#allocation2 + $0x8] sm:$0xc0] }
  0x9c   : > { %783 = vmatpush1.bf16.msra.mxu0 %v4465_v2 }
  0x9d   : > { %784 = vmatprep.subr.bf16.mxu0 %v4470_v3  ;;  %v2083_v3 = vshrl.u32 %v2022_v58, 16 }
  0xa0   : > { %785 = vmatpush1.bf16.msra.mxu0 %v4468_v4  ;;  %v5135_v4 = vshll.u32 %v1621_v61, 16 }
  0xa1   : > { %786 = vmatprep.subr.bf16.mxu0 %v4473_v5  ;;  %v2086_v5 = vshll.u32 %v2022_v58, 16  ;;  %v4517_v58 = vld [vmem:[%s5574_s3 + $0x300] sm:$0xff]  }
  0xa3   : > { %v5145_v17 = vrot.slane %v2086_v5, 2 }
  0xa4   : > { %787 = vmatpush1.bf16.msra.mxu0 %v4471_v6 }
  0xa5   : > { %788 = vmatprep.subr.bf16.mxu0 %v4476_v7  ;;  %v1677_v7 = vshll.u32 %v1622_v63, 16 }
  0xa8   : > { %789 = vmatpush1.bf16.msra.mxu0 %v4474_v8 }
  0xa9   : > { %4027 = vmatprep.subr.bf16.mxu0 %v4483_v9 }
  0xab   : > { %791 = vmatmul.mubr.bf16.vlgmr.msra.gmra.mrb[0].mxu0 %v4477_v10  ;;  %v855_v10 = vld [vmem:[#allocation2] sm:$0xc0] }
  0xac   : > { %4028 = vmatpush3.bf16.msra.mxu0 %v4485_v11  ;;  %v5138_v11 = vrot.slane %v2083_v3, 1  ;;  %v4519_v3 = vld [vmem:[%s5574_s3 + $0x348] sm:$0xff]  }
  0xad   : > { %4029 = vmatprep.subr.bf16.mxu0 %v4487_v12 }
  0xae   : > { %v2089_v61 = vor.u32 %v5145_v17, %v5138_v11  ;;  %v4520_v11 = vld [vmem:[%s5574_s3 + $0x10] sm:$0xff]   ;;  %v4527_v17 = vld [vmem:[%s5574_s3 + $0x358] sm:$0xff]  }
  0xb0   : > { %4030 = vmatpush3.bf16.msra.mxu0 %v4489_v13 }
  0xb1   : > { %4031 = vmatprep.subr.bf16.mxu0 %v4491_v14 }
  0xb4   : > { %4032 = vmatpush3.bf16.msra.mxu0 %v4493_v16  ;;  %v1667_v16 = vrot.slane %v5135_v4, 1  ;;  %v4516_v4 = vld [vmem:[%s5574_s3 + $0x8] sm:$0xff]  }
  0xb5   : > { %4033 = vmatprep.subr.bf16.mxu0 %v4495_v19 }
  0xb8   : > { %4034 = vmatpush3.bf16.msra.mxu0 %v4497_v20  ;;  %v1679_v20 = vrot.slane %v1677_v7, 1  ;;  %v4518_v7 = vld [vmem:[%s5574_s3 + $0x50] sm:$0xff]  }
  0xb9   : > { %4035 = vmatprep.subr.bf16.mxu0 %v4499_v23 }
  0xbc   : > { %4036 = vmatpush3.bf16.msra.mxu0 %v4501_v24 }
  0xbd   : > { %4037 = vmatprep.subr.bf16.mxu0 %v4503_v28 }
  0xc0   : > { %4038 = vmatpush3.bf16.msra.mxu0 %v4505_v29 }
  0xc1   : > { %4039 = vmatprep.subr.bf16.mxu0 %v4507_v31 }
  0xc4   : > { %4040 = vmatpush3.bf16.msra.mxu0 %v4509_v33 }
  0xc5   : > { %4041 = vmatprep.subr.bf16.mxu0 %v4511_v35 }
  0xc8   : > { %4042 = vmatpush3.bf16.msra.mxu0 %v4513_v37 }
  0xc9   : > { %4071 = vmatprep.subr.bf16.mxu0 %v4515_v38 }
 0x17e   : > { %v792_v46 = vpop.f32.mrb[0].mxu0 }
 0x17f   : > { %v4347_v48 = vadd.f32 %v792_v46, %v368_v44  ;;  %v794_v49 = vpop.f32.mrb[1].mxu0 }
 0x180   : > { %v4348_v51 = vadd.f32 %v794_v49, %v372_v45  ;;  %v796_v52 = vpop.f32.mrb[2].mxu0 }
 0x181   : > { %v5122_v54 = vmax.f32 %v4347_v48, 0.0  ;;  %v4349_v55 = vadd.f32 %v796_v52, %v368_v44  ;;  %v798_v56 = vpop.f32.mrb[3].mxu0  ;;  %v4514_v52 = vld [vmem:[%s5574_s3 + $0x48] sm:$0xff]  }
 0x182   : > { %v5124_v59 = vmax.f32 %v4348_v51, 0.0  ;;  %v4350_v60 = vadd.f32 %v798_v56, %v372_v45 }
 0x183   : > { %809 = vst [vmem:[#allocation2 + $0x10] sm:$0xff] %v5122_v54  ;;  %v5127_v62 = vmax.f32 %v4349_v55, 0.0  ;;  %v859_v29 = vpack.c.bf16 %v5122_v54, %v855_v10  ;;  %v4523_v10 = vld [vmem:[%s5574_s3 + $0x350] sm:$0xff]  }
 0x184   : > { %810 = vst [vmem:[#allocation2 + $0x18] sm:$0xff] %v5124_v59  ;;  %v5130_v0 = vmax.f32 %v4350_v60, 0.0  ;;  %v820_v2 = vpack.c.bf16 %v5124_v59, %v814_v57  ;;  %v860_v6 = vpack.c.bf16 %v5124_v59, %v856_v1 }
 0x185   : > { %811 = vst [vmem:[#allocation2 + $0x20] sm:$0xff] %v5127_v62  ;;  %v1439_v13 = vpack.c.bf16 %v5127_v62, %v5122_v54  ;;  %v901_v46 = vrot.slane %v859_v29, 3  ;;  %v4533_v29 = vld [vmem:[%s5574_s3 + $0x320] sm:$0xff]  }
 0x186   : > { %812 = vst [vmem:[#allocation2 + $0x28] sm:$0xff] %v5130_v0  ;;  %v1065_v8 = vshrl.u32 %v820_v2, 16  ;;  %v1068_v9 = vshll.u32 %v820_v2, 16  ;;  %v1440_v12 = vpack.c.bf16 %v5130_v0, %v5124_v59  ;;  %v904_v18 = vrot.slane %v860_v6, 3 }
 0x188   : > { %v1067_v24 = vrot.slane %v1065_v8, 2  ;;  %v1070_v25 = vrot.slane %v1068_v9, 3  ;;  %v4521_v9 = vld [vmem:[%s5574_s3 + $0x308] sm:$0xff]  }
 0x18a   : > { %v1613_v14 = vld [vmem:[#allocation2 + $0x10] sm:$0xfe]  ;;  %v1071_v63 = vor.u32 %v1070_v25, %v1067_v24 }
 0x18b   : > { %v1614_v19 = vld [vmem:[#allocation2 + $0x18] sm:$0xfe]  ;;  %v1619_v21 = vpack.c.bf16 %v5127_v62, %v1613_v14  ;;  %v2017_v25 = vld [vmem:[#allocation2 + $0x30] sm:$0x7] }
 0x18c   : > { %v2016_v22 = vld [vmem:[#allocation2 + $0x18] sm:$0xf8]  ;;  %v857_v23 = vld [vmem:[#allocation2 + $0x20] sm:$0x3f]  ;;  %v1620_v26 = vpack.c.bf16 %v5130_v0, %v1614_v19 }
 0x18d   : > { %v2020_v27 = vpack.c.bf16 %v5130_v0, %v2016_v22  ;;  %v858_v28 = vld [vmem:[#allocation2 + $0x28] sm:$0x3f]  ;;  %v861_v30 = vpack.c.bf16 %v857_v23, %v857_v23  ;;  %v1658_v32 = vshrl.u32 %v1619_v21, 16  ;;  %v1660_v33 = vshll.u32 %v1619_v21, 16  ;;  %v4522_v14 = vld [vmem:[%s5574_s3 + $0x58] sm:$0xff]   ;;  %v4526_v19 = vld [vmem:[%s5574_s3 + $0x60] sm:$0xff]  }
 0x18e   : > { %v818_v31 = vld [vmem:[#allocation2 + $0x28] sm:$0x1f]  ;;  %v862_v34 = vpack.c.bf16 %v858_v28, %v858_v28  ;;  %v1670_v36 = vshrl.u32 %v1620_v26, 16  ;;  %v1672_v37 = vshll.u32 %v1620_v26, 16  ;;  %v4531_v21 = vld [vmem:[%s5574_s3 + $0x360] sm:$0xff]  }
 0x18f   : > { %v822_v35 = vpack.c.bf16 %v818_v31, %v818_v31  ;;  %v902_v38 = vrot.slane %v861_v30, 3  ;;  %v1662_v39 = vrot.slane %v1660_v33, 1  ;;  %v2075_v40 = vshrl.u32 %v2020_v27, 16  ;;  %v817_v22 = vld [vmem:[#allocation2 + $0x20] sm:$0x1f]  ;;  %v4530_v26 = vld [vmem:[%s5574_s3 + $0x68] sm:$0xff]  }
 0x190   : > { %v2078_v41 = vshll.u32 %v2020_v27, 16  ;;  %v905_v42 = vrot.slane %v862_v34, 3  ;;  %v1674_v45 = vrot.slane %v1672_v37, 1  ;;  %v4528_v23 = vld [vmem:[%s5574_s3 + $0x20] sm:$0xff]   ;;  %v1223_v24 = vld [vmem:[#allocation2 + $0x28] sm:$0x7f]  ;;  %v821_v30 = vpack.c.bf16 %v817_v22, %v817_v22 }
 0x191   : > { %v1073_v43 = vshrl.u32 %v822_v35, 16  ;;  %v1076_v44 = vshll.u32 %v822_v35, 16  ;;  %v1663_v48 = vor.u32 %v1662_v39, %v1658_v32  ;;  %v2077_v49 = vrot.slane %v2075_v40, 1  ;;  %v813_v27 = vld [vmem:[#allocation2] sm:$0xe0]  ;;  %v4535_v32 = vld [vmem:[%s5574_s3 + $0x368] sm:$0xff]  }
 0x192   : > { %v2080_v50 = vrot.slane %v2078_v41, 2  ;;  %v906_v51 = vsel %vm900_vm0, %v904_v18, %v905_v42  ;;  %v1675_v56 = vor.u32 %v1674_v45, %v1670_v36  ;;  %v903_v57 = vsel %vm900_vm0, %v901_v46, %v902_v38  ;;  %v4524_v18 = vld [vmem:[%s5574_s3 + $0x18] sm:$0xff]   ;;  %v2015_v28 = vld [vmem:[#allocation2 + $0x10] sm:$0xf8]  ;;  %v1221_v31 = vld [vmem:[#allocation2 + $0x8] sm:$0x80] }
 0x193   : > { %v1075_v53 = vrot.slane %v1073_v43, 2  ;;  %v1078_v55 = vrot.slane %v1076_v44, 3  ;;  %1037 = vmatprep.mubr.bf16.mxu1 %v906_v51  ;;  %v1668_v5 = vsel %vm1656_vm1, %v1663_v48, %v1667_v16  ;;  %v4525_v16 = vld [vmem:[%s5574_s3 + $0x310] sm:$0xff]   ;;  %v1227_v33 = vpack.c.bf16 %v1223_v24, %v1223_v24  ;;  %v4532_v35 = vld [vmem:[%s5574_s3 + $0x28] sm:$0xff]  }
 0x194   : > { %v2081_v60 = vor.u32 %v2080_v50, %v2077_v49  ;;  %1038 = vmatmul.mubr.bf16.vlgmr.msra.gmra.mrb[0].mxu1 %v903_v57  ;;  %v1680_v2 = vsel %vm1656_vm1, %v1675_v56, %v1679_v20  ;;  %v4529_v20 = vld [vmem:[%s5574_s3 + $0x318] sm:$0xff]   ;;  %v2021_v34 = vpack.c.bf16 %v2017_v25, %v2017_v25  ;;  %v819_v36 = vpack.c.bf16 %v5122_v54, %v813_v27  ;;  %v4534_v38 = vld [vmem:[%s5574_s3 + $0x70] sm:$0xff]   ;;  %v4537_v40 = vld [vmem:[%s5574_s3 + $0x328] sm:$0xff]  }
 0x195   : > { %v1079_v1 = vor.u32 %v1078_v55, %v1075_v53  ;;  %3962 = vmatpush3.bf16.msra.mxu1 %v4512_v47  ;;  %1811 = vmatprep.mubr.bf16.mxu0 %v1680_v2  ;;  %v2019_v37 = vpack.c.bf16 %v5127_v62, %v2015_v28  ;;  %v1225_v39 = vpack.c.bf16 %v5124_v59, %v1221_v31  ;;  %v1056_v41 = vshrl.u32 %v821_v30, 16  ;;  %v4539_v43 = vld [vmem:[%s5574_s3 + $0x370] sm:$0xff]   ;;  %v4538_v53 = vld [vmem:[%s5574_s3 + $0x78] sm:$0xff]   ;;  %v4547_v27 = vld [vmem:[%s5574_s3 + $0x108] sm:$0xff]  }
 0x196   : > { %3963 = vmatprep.subr.bf16.mxu1 %v4514_v52  ;;  %1812 = vmatmul.mubr.bf16.vlgmr.msra.gmra.mrb[4].mxu0 %v1668_v5  ;;  %v2090_v8 = vsel %vm2056_vm3, %v2081_v60, %v2089_v61  ;;  %v1059_v42 = vshll.u32 %v821_v30, 16  ;;  %v1288_v44 = vshrl.u32 %v1227_v33, 16  ;;  %v1291_v45 = vshll.u32 %v1227_v33, 16  ;;  %v4536_v48 = vld [vmem:[%s5574_s3 + $0x30] sm:$0xff]   ;;  %v4543_v61 = vld [vmem:[%s5574_s3 + $0x378] sm:$0xff]  }
 0x197   : > { %v1080_v6 = vsel %vm1046_vm2, %v1071_v63, %v1079_v1  ;;  %4072 = vmatpush3.bf16.msra.mxu0 %v4517_v58  ;;  %2221 = vmatprep.mubr.bf16.mxu0 %v2090_v8  ;;  %v2066_v46 = vshrl.u32 %v2021_v34, 16  ;;  %v2069_v47 = vshll.u32 %v2021_v34, 16  ;;  %v1048_v49 = vshrl.u32 %v819_v36, 16  ;;  %v4541_v57 = vld [vmem:[%s5574_s3 + $0x330] sm:$0xff]   ;;  %v4550_v30 = vld [vmem:[%s5574_s3 + $0x158] sm:$0xff]   ;;  %v4553_v34 = vld [vmem:[%s5574_s3 + $0x120] sm:$0xff]  }
 0x198   : > { %1211 = vmatprep.mubr.bf16.mxu1 %v1080_v6  ;;  %4073 = vmatprep.subr.bf16.mxu0 %v4519_v3  ;;  %v1051_v50 = vshll.u32 %v819_v36, 16  ;;  %v2058_v51 = vshrl.u32 %v2019_v37, 16  ;;  %v2061_v52 = vshll.u32 %v2019_v37, 16  ;;  %v1280_v55 = vshrl.u32 %v1225_v39, 16  ;;  %v4548_v28 = vld [vmem:[%s5574_s3 + $0x150] sm:$0xff]   ;;  %v4551_v31 = vld [vmem:[%s5574_s3 + $0x118] sm:$0xff]  }
 0x199   : > { %3964 = vmatpush3.bf16.msra.mxu1 %v4516_v4  ;;  %v1283_v56 = vshll.u32 %v1225_v39, 16  ;;  %v1058_v58 = vrot.slane %v1056_v41, 2  ;;  %v1061_v60 = vrot.slane %v1059_v42, 3  ;;  %v1290_v63 = vrot.slane %v1288_v44, 3  ;;  %v4540_v4 = vld [vmem:[%s5574_s3 + $0x38] sm:$0xff]  }
 0x19a   : > { %3965 = vmatprep.subr.bf16.mxu1 %v4518_v7  ;;  %v1293_v1 = vrot.slane %v1291_v45, 4  ;;  %v2068_v2 = vrot.slane %v2066_v46, 1  ;;  %v2071_v3 = vrot.slane %v2069_v47, 2  ;;  %v1050_v5 = vrot.slane %v1048_v49, 2  ;;  %v1222_v33 = vld [vmem:[#allocation2 + $0x20] sm:$0x7f] }
 0x19b   : > { %4074 = vmatpush3.bf16.msra.mxu0 %v4521_v9  ;;  %v1053_v6 = vrot.slane %v1051_v50, 3  ;;  %v2060_v7 = vrot.slane %v2058_v51, 1  ;;  %v2063_v8 = vrot.slane %v2061_v52, 2  ;;  %v4542_v9 = vld [vmem:[%s5574_s3 + $0x140] sm:$0xff]   ;;  %v1226_v37 = vpack.c.bf16 %v1222_v33, %v1222_v33  ;;  %v4558_v46 = vld [vmem:[%s5574_s3 + $0x178] sm:$0xff]  }
 0x19c   : > { %4075 = vmatprep.subr.bf16.mxu0 %v4523_v10  ;;  %v1282_v10 = vrot.slane %v1280_v55, 3  ;;  %v1220_v36 = vld [vmem:[#allocation2] sm:$0x80]  ;;  %v4559_v49 = vld [vmem:[%s5574_s3 + $0x138] sm:$0xff]  }
 0x19d   : > { %3966 = vmatpush3.bf16.msra.mxu1 %v4520_v11  ;;  %v1285_v11 = vrot.slane %v1283_v56, 4  ;;  %v1224_v39 = vpack.c.bf16 %v5122_v54, %v1220_v36  ;;  %v1271_v41 = vshrl.u32 %v1226_v37, 16  ;;  %v1274_v42 = vshll.u32 %v1226_v37, 16  ;;  %v4560_v52 = vld [vmem:[%s5574_s3 + $0x1c0] sm:$0xff]   ;;  %v4566_v59 = vld [vmem:[%s5574_s3 + $0x1d8] sm:$0xff]  }
 0x19e   : > { %3967 = vmatprep.subr.bf16.mxu1 %v4522_v14  ;;  %v1062_v14 = vor.u32 %v1061_v60, %v1058_v58  ;;  %v4561_v56 = vld [vmem:[%s5574_s3 + $0x180] sm:$0xff]   ;;  %v4563_v60 = vld [vmem:[%s5574_s3 + $0x188] sm:$0xff]   ;;  %v4582_v54 = vld [vmem:[%s5574_s3 + $0x2d8] sm:$0xff]  }
 0x19f   : > { %4076 = vmatpush3.bf16.msra.mxu0 %v4525_v16  ;;  %v4545_v16 = vld [vmem:[%s5574_s3 + $0x338] sm:$0xff]   ;;  %v1286_v22 = vor.u32 %v1285_v11, %v1282_v10  ;;  %v1263_v44 = vshrl.u32 %v1224_v39, 16  ;;  %v1266_v45 = vshll.u32 %v1224_v39, 16  ;;  %v1273_v47 = vrot.slane %v1271_v41, 3  ;;  %v4592_v41 = vld [vmem:[%s5574_s3 + $0x3c0] sm:$0xff]  }
 0x1a0   : > { %4077 = vmatprep.subr.bf16.mxu0 %v4527_v17  ;;  %v1294_v17 = vor.u32 %v1293_v1, %v1290_v63  ;;  %v4565_v63 = vld [vmem:[%s5574_s3 + $0x190] sm:$0xff]   ;;  %v4568_v1 = vld [vmem:[%s5574_s3 + $0x1e0] sm:$0xff]   ;;  %v2233_v33 = vld [vmem:[#allocation2 + $0x18] sm:$0xf0] }
 0x1a1   : > { %3968 = vmatpush3.bf16.msra.mxu1 %v4524_v18  ;;  %v1054_v18 = vor.u32 %v1053_v6, %v1050_v5  ;;  %v1265_v50 = vrot.slane %v1263_v44, 3  ;;  %v1268_v51 = vrot.slane %v1266_v45, 4  ;;  %v4572_v5 = vld [vmem:[%s5574_s3 + $0x1f0] sm:$0xff]  }
 0x1a2   : > { %3969 = vmatprep.subr.bf16.mxu1 %v4526_v19  ;;  %v4544_v19 = vld [vmem:[%s5574_s3 + $0x100] sm:$0xff]   ;;  %v1295_v25 = vsel %vm1261_vm4, %v1286_v22, %v1294_v17  ;;  %v4573_v6 = vld [vmem:[%s5574_s3 + $0x1b0] sm:$0xff]   ;;  %v4579_v22 = vld [vmem:[%s5574_s3 + $0x288] sm:$0xff]  }
 0x1a3   : > { %4078 = vmatpush3.bf16.msra.mxu0 %v4529_v20  ;;  %v2064_v20 = vor.u32 %v2063_v8, %v2060_v7  ;;  %v1063_v24 = vsel %vm1046_vm2, %v1054_v18, %v1062_v14  ;;  %v1269_v55 = vor.u32 %v1268_v51, %v1265_v50  ;;  %v1823_v7 = vld [vmem:[#allocation2 + $0x18] sm:$0xfc]  ;;  %v1825_v8 = vld [vmem:[#allocation2 + $0x38] sm:$0x3]  ;;  %v4596_v50 = vld [vmem:[%s5574_s3 + $0x3d0] sm:$0xff]  }
 0x1a4   : > { %4079 = vmatprep.subr.bf16.mxu0 %v4531_v21  ;;  %v2072_v21 = vor.u32 %v2071_v3, %v2068_v2  ;;  %v4569_v2 = vld [vmem:[%s5574_s3 + $0x1a0] sm:$0xff]   ;;  %v4570_v3 = vld [vmem:[%s5574_s3 + $0x1e8] sm:$0xff]   ;;  %v1827_v10 = vpack.c.bf16 %v5130_v0, %v1823_v7  ;;  %v1829_v11 = vpack.c.bf16 %v1825_v8, %v1825_v8  ;;  %v4575_v14 = vld [vmem:[%s5574_s3 + $0x1b8] sm:$0xff]  }
 0x1a5   : > { %3970 = vmatpush3.bf16.msra.mxu1 %v4528_v23  ;;  %v4546_v23 = vld [vmem:[%s5574_s3 + $0x148] sm:$0xff]   ;;  %v4597_v51 = vld [vmem:[%s5574_s3 + $0x390] sm:$0xff]  }
 0x1a6   : > { %3971 = vmatprep.subr.bf16.mxu1 %v4530_v26  ;;  %v2073_v26 = vsel %vm2056_vm3, %v2064_v20, %v2072_v21  ;;  %v1871_v17 = vrot.slane %v1827_v10, 1  ;;  %v1872_v18 = vrot.slane %v1829_v11, 1  ;;  %v4578_v20 = vld [vmem:[%s5574_s3 + $0x2c8] sm:$0xff]  }
 0x1a7   : > { %4080 = vmatpush3.bf16.msra.mxu0 %v4533_v29  ;;  %v4549_v29 = vld [vmem:[%s5574_s3 + $0x110] sm:$0xff]  }
 0x1a8   : > { %4081 = vmatprep.subr.bf16.mxu0 %v4535_v32  ;;  %v4552_v32 = vld [vmem:[%s5574_s3 + $0x160] sm:$0xff]   ;;  %v1873_v21 = vsel %vm1867_vm5, %v1871_v17, %v1872_v18 }
 0x1a9   : > { %3972 = vmatpush3.bf16.msra.mxu1 %v4532_v35  ;;  %v4554_v35 = vld [vmem:[%s5574_s3 + $0x168] sm:$0xff]  }
 0x1aa   : > { %3973 = vmatprep.subr.bf16.mxu1 %v4534_v38  ;;  %v4555_v38 = vld [vmem:[%s5574_s3 + $0x128] sm:$0xff]  }
 0x1ab   : > { %4082 = vmatpush3.bf16.msra.mxu0 %v4537_v40  ;;  %v4556_v40 = vld [vmem:[%s5574_s3 + $0x170] sm:$0xff]  }
 0x1ac   : > { %4083 = vmatprep.subr.bf16.mxu0 %v4539_v43  ;;  %v4557_v43 = vld [vmem:[%s5574_s3 + $0x130] sm:$0xff]  }
 0x1ad   : > { %3974 = vmatpush3.bf16.msra.mxu1 %v4536_v48  ;;  %v1276_v48 = vrot.slane %v1274_v42, 4 }
 0x1ae   : > { %3975 = vmatprep.subr.bf16.mxu1 %v4538_v53 }
 0x1af   : > { %4084 = vmatpush3.bf16.msra.mxu0 %v4541_v57  ;;  %v1277_v53 = vor.u32 %v1276_v48, %v1273_v47  ;;  %v4562_v57 = vld [vmem:[%s5574_s3 + $0x1c8] sm:$0xff]  }
 0x1b0   : > { %4085 = vmatprep.subr.bf16.mxu0 %v4543_v61  ;;  %v4564_v61 = vld [vmem:[%s5574_s3 + $0x1d0] sm:$0xff]  }
 0x1b1   : > { %3976 = vmatpush3.bf16.msra.mxu1 %v4540_v4  ;;  %v1278_v58 = vsel %vm1261_vm4, %v1269_v55, %v1277_v53  ;;  %v4571_v4 = vld [vmem:[%s5574_s3 + $0x1a8] sm:$0xff]   ;;  %v4599_v53 = vld [vmem:[%s5574_s3 + $0x398] sm:$0xff]   ;;  %v4600_v55 = vld [vmem:[%s5574_s3 + $0x3e0] sm:$0xff]  }
 0x1b2   : > { %3983 = vmatprep.subr.bf16.mxu1 %v4542_v9  ;;  %v4574_v9 = vld [vmem:[%s5574_s3 + $0x1f8] sm:$0xff]  }
 0x1b3   : > { %4086 = vmatpush3.bf16.msra.mxu0 %v4545_v16  ;;  %v4576_v16 = vld [vmem:[%s5574_s3 + $0x2c0] sm:$0xff]  }
 0x1b4   : > { %1212 = vmatmul.mubr.bf16.vlgmr.msra.gmra.mrb[4].mxu1 %v1063_v24  ;;  %4187 = vmatprep.subr.bf16.mxu0 %v4716_v15  ;;  %v4581_v24 = vld [vmem:[%s5574_s3 + $0x290] sm:$0xff]  }
 0x1b5   : > { %3984 = vmatpush3.bf16.msra.mxu1 %v4544_v19  ;;  %1426 = vmatprep.mubr.bf16.mxu1 %v1295_v25  ;;  %v4577_v19 = vld [vmem:[%s5574_s3 + $0x280] sm:$0xff]  }
 0x1b6   : > { %3985 = vmatprep.subr.bf16.mxu1 %v4546_v23  ;;  %2222 = vmatmul.mubr.bf16.vlgmr.msra.gmra.mrb[8].mxu0 %v2073_v26  ;;  %v4580_v23 = vld [vmem:[%s5574_s3 + $0x2d0] sm:$0xff]   ;;  %v4584_v25 = vld [vmem:[%s5574_s3 + $0x2e0] sm:$0xff]  }
 0x1b7   : > { %v4585_v26 = vld [vmem:[%s5574_s3 + $0x2a0] sm:$0xff]   ;;  %4203 = vmatprep.mubr.msk.bf16.mxu0 %vm4717_vm7, %v4716_v15 }
 0x1b9   : > { %3986 = vmatpush3.bf16.msra.mxu1 %v4547_v27  ;;  %v4586_v27 = vld [vmem:[%s5574_s3 + $0x2e8] sm:$0xff]  }
 0x1ba   : > { %3987 = vmatprep.subr.bf16.mxu1 %v4548_v28  ;;  %v4587_v28 = vld [vmem:[%s5574_s3 + $0x2a8] sm:$0xff]  }
 0x1bd   : > { %3988 = vmatpush3.bf16.msra.mxu1 %v4549_v29  ;;  %v4588_v29 = vld [vmem:[%s5574_s3 + $0x2f0] sm:$0xff]  }
 0x1be   : > { %3989 = vmatprep.subr.bf16.mxu1 %v4550_v30  ;;  %v1822_v30 = vld [vmem:[#allocation2 + $0x10] sm:$0xfc] }
 0x1bf   : > { %v1826_v36 = vpack.c.bf16 %v5127_v62, %v1822_v30 }
 0x1c1   : > { %3990 = vmatpush3.bf16.msra.mxu1 %v4551_v31  ;;  %v1824_v31 = vld [vmem:[#allocation2 + $0x30] sm:$0x3]  ;;  %v1868_v42 = vrot.slane %v1826_v36, 1 }
 0x1c2   : > { %3991 = vmatprep.subr.bf16.mxu1 %v4552_v32  ;;  %v4589_v32 = vld [vmem:[%s5574_s3 + $0x2b0] sm:$0xff]   ;;  %v1828_v37 = vpack.c.bf16 %v1824_v31, %v1824_v31 }
 0x1c5   : > { %3992 = vmatpush3.bf16.msra.mxu1 %v4553_v34  ;;  %v2235_v34 = vld [vmem:[#allocation2 + $0x38] sm:$0xf] }
 0x1c6   : > { %3993 = vmatprep.subr.bf16.mxu1 %v4554_v35  ;;  %v4590_v35 = vld [vmem:[%s5574_s3 + $0x2f8] sm:$0xff]   ;;  %v2239_v39 = vpack.c.bf16 %v2235_v34, %v2235_v34 }
 0x1c8   : > { %v2282_v45 = vrot.slane %v2239_v39, 2  ;;  %v4614_v39 = vld [vmem:[#allocation4 + $0x58] sm:$0xff]  }
 0x1c9   : > { %3994 = vmatpush3.bf16.msra.mxu1 %v4555_v38  ;;  %v2237_v38 = vpack.c.bf16 %v5130_v0, %v2233_v33  ;;  %v4593_v0 = vld [vmem:[%s5574_s3 + $0x380] sm:$0xff]  }
 0x1ca   : > { %3995 = vmatprep.subr.bf16.mxu1 %v4556_v40  ;;  %v4591_v40 = vld [vmem:[%s5574_s3 + $0x2b8] sm:$0xff]  }
 0x1cb   : > { %v2281_v44 = vrot.slane %v2237_v38, 2 }
 0x1cd   : > { %3996 = vmatpush3.bf16.msra.mxu1 %v4557_v43  ;;  %v1869_v43 = vrot.slane %v1828_v37, 1  ;;  %v2283_v48 = vsel %vm2277_vm6, %v2281_v44, %v2282_v45  ;;  %v4619_v44 = vld [vmem:[#allocation4 + $0x28] sm:$0xff]   ;;  %v4620_v45 = vld [vmem:[#allocation4 + $0x70] sm:$0xff]  }
 0x1ce   : > { %3997 = vmatprep.subr.bf16.mxu1 %v4558_v46  ;;  %v4594_v46 = vld [vmem:[%s5574_s3 + $0x3c8] sm:$0xff]  }
 0x1cf   : > { %v1870_v47 = vsel %vm1867_vm5, %v1868_v42, %v1869_v43  ;;  %v4617_v42 = vld [vmem:[#allocation4 + $0x20] sm:$0xff]   ;;  %v4618_v43 = vld [vmem:[#allocation4 + $0x68] sm:$0xff]  }
 0x1d1   : > { %3998 = vmatpush3.bf16.msra.mxu1 %v4559_v49  ;;  %v4595_v49 = vld [vmem:[%s5574_s3 + $0x388] sm:$0xff]  }
 0x1d2   : > { %4005 = vmatprep.subr.bf16.mxu1 %v4560_v52  ;;  %v4598_v52 = vld [vmem:[%s5574_s3 + $0x3d8] sm:$0xff]  }
 0x1d4   : > { %1427 = vmatmul.mubr.bf16.vlgmr.msra.gmra.mrb[8].mxu1 %v1278_v58  ;;  %v4603_v58 = vld [vmem:[%s5574_s3 + $0x3a8] sm:$0xff]  }
 0x1d5   : > { %4006 = vmatpush3.bf16.msra.mxu1 %v4561_v56  ;;  %1602 = vmatprep.mubr.bf16.mxu1 %v1440_v12  ;;  %v4567_v12 = vld [vmem:[%s5574_s3 + $0x198] sm:$0xff]   ;;  %v4601_v56 = vld [vmem:[%s5574_s3 + $0x3a0] sm:$0xff]  }
 0x1d6   : > { %4007 = vmatprep.subr.bf16.mxu1 %v4562_v57  ;;  %v4602_v57 = vld [vmem:[%s5574_s3 + $0x3e8] sm:$0xff]  }
 0x1d9   : > { %4008 = vmatpush3.bf16.msra.mxu1 %v4563_v60  ;;  %v4604_v60 = vld [vmem:[%s5574_s3 + $0x3f0] sm:$0xff]  }
 0x1da   : > { %4009 = vmatprep.subr.bf16.mxu1 %v4564_v61  ;;  %v2232_v61 = vld [vmem:[#allocation2 + $0x10] sm:$0xf0] }
 0x1dd   : > { %4010 = vmatpush3.bf16.msra.mxu1 %v4565_v63  ;;  %v2234_v63 = vld [vmem:[#allocation2 + $0x30] sm:$0xf] }
 0x1de   : > { %4011 = vmatprep.subr.bf16.mxu1 %v4566_v59  ;;  %v4605_v59 = vld [vmem:[%s5574_s3 + $0x3b0] sm:$0xff]  }
 0x1e1   : > { %4012 = vmatpush3.bf16.msra.mxu1 %v4567_v12  ;;  %v4606_v12 = vld [vmem:[%s5574_s3 + $0x3f8] sm:$0xff]  }
 0x1e2   : > { %4013 = vmatprep.subr.bf16.mxu1 %v4568_v1  ;;  %v2236_v1 = vpack.c.bf16 %v5127_v62, %v2232_v61 }
 0x1e5   : > { %4014 = vmatpush3.bf16.msra.mxu1 %v4569_v2  ;;  %v2238_v2 = vpack.c.bf16 %v2234_v63, %v2234_v63 }
 0x1e6   : > { %4015 = vmatprep.subr.bf16.mxu1 %v4570_v3  ;;  %v4607_v3 = vld [vmem:[%s5574_s3 + $0x3b8] sm:$0xff]  }
 0x1e9   : > { %4016 = vmatpush3.bf16.msra.mxu1 %v4571_v4  ;;  %v2278_v4 = vrot.slane %v2236_v1, 2 }
 0x1ea   : > { %4017 = vmatprep.subr.bf16.mxu1 %v4572_v5  ;;  %v2279_v5 = vrot.slane %v2238_v2, 2 }
 0x1ed   : > { %4018 = vmatpush3.bf16.msra.mxu1 %v4573_v6  ;;  %v2280_v6 = vsel %vm2277_vm6, %v2278_v4, %v2279_v5 }
 0x1ee   : > { %4019 = vmatprep.subr.bf16.mxu1 %v4574_v9 }
 0x1f1   : > { %4020 = vmatpush3.bf16.msra.mxu1 %v4575_v14 }
 0x1f2   : > { %4049 = vmatprep.subr.bf16.mxu1 %v4576_v16 }
 0x1f4   : > { %1603 = vmatmul.mubr.bf16.vlgmr.msra.gmra.mrb[12].mxu1 %v1439_v13  ;;  %v4583_v13 = vld [vmem:[%s5574_s3 + $0x298] sm:$0xff]  }
 0x1f5   : > { %4050 = vmatpush3.bf16.msra.mxu1 %v4577_v19  ;;  %2004 = vmatprep.mubr.bf16.mxu1 %v1873_v21  ;;  %v4608_v21 = vld [vmem:[#allocation4 + $0x40] sm:$0xff]  }
 0x1f6   : > { %4051 = vmatprep.subr.bf16.mxu1 %v4578_v20  ;;  %4188 = vmatpush3.bf16.msra.mxu0 %v4608_v21 }
 0x1f7   : > { %4189 = vmatprep.subr.bf16.mxu0 %v4716_v15 }
 0x1f9   : > { %4052 = vmatpush3.bf16.msra.mxu1 %v4579_v22  ;;  %v4609_v22 = vld [vmem:[#allocation4] sm:$0xff]  }
 0x1fa   : > { %4053 = vmatprep.subr.bf16.mxu1 %v4580_v23  ;;  %v4610_v23 = vld [vmem:[#allocation4 + $0x48] sm:$0xff]  }
 0x1fb   : > { %4190 = vmatpush3.bf16.msra.mxu0 %v4610_v23 }
 0x1fc   : > { %4191 = vmatprep.subr.bf16.mxu0 %v4716_v15 }
 0x1fd   : > { %4054 = vmatpush3.bf16.msra.mxu1 %v4581_v24  ;;  %v4611_v24 = vld [vmem:[#allocation4 + $0x8] sm:$0xff]  }
 0x1fe   : > { %4055 = vmatprep.subr.bf16.mxu1 %v4582_v54  ;;  %v4612_v54 = vld [vmem:[#allocation4 + $0x50] sm:$0xff]  }
 0x1ff   : > { %4192 = vmatpush3.bf16.msra.mxu0 %v4612_v54 }
 0x200   : > { %4193 = vmatprep.subr.bf16.mxu0 %v4716_v15 }
 0x201   : > { %4056 = vmatpush3.bf16.msra.mxu1 %v4583_v13  ;;  %v4613_v13 = vld [vmem:[#allocation4 + $0x10] sm:$0xff]  }
 0x202   : > { %4057 = vmatprep.subr.bf16.mxu1 %v4584_v25 }
 0x203   : > { %4194 = vmatpush3.bf16.msra.mxu0 %v4614_v39  ;;  %v4629_v39 = vld [vmem:[#allocation4 + $0xd0] sm:$0xff]  }
 0x204   : > { %4195 = vmatprep.subr.bf16.mxu0 %v4716_v15 }
 0x205   : > { %4058 = vmatpush3.bf16.msra.mxu1 %v4585_v26 }
 0x206   : > { %4059 = vmatprep.subr.bf16.mxu1 %v4586_v27 }
 0x209   : > { %4060 = vmatpush3.bf16.msra.mxu1 %v4587_v28 }
 0x20a   : > { %4061 = vmatprep.subr.bf16.mxu1 %v4588_v29 }
 0x20d   : > { %4062 = vmatpush3.bf16.msra.mxu1 %v4589_v32 }
 0x20e   : > { %4063 = vmatprep.subr.bf16.mxu1 %v4590_v35 }
 0x211   : > { %4064 = vmatpush3.bf16.msra.mxu1 %v4591_v40  ;;  %v4615_v40 = vld [vmem:[#allocation4 + $0x18] sm:$0xff]  }
 0x212   : > { %4093 = vmatprep.subr.bf16.mxu1 %v4592_v41  ;;  %v4616_v41 = vld [vmem:[#allocation4 + $0x60] sm:$0xff]  }
 0x213   : > { %4196 = vmatpush3.bf16.msra.mxu0 %v4616_v41  ;;  %v4631_v41 = vld [vmem:[#allocation4 + $0xd8] sm:$0xff]  }
 0x214   : > { %2005 = vmatmul.mubr.bf16.vlgmr.msra.gmra.mrb[16].mxu1 %v1870_v47  ;;  %4197 = vmatprep.subr.bf16.mxu0 %v4716_v15  ;;  %v4623_v47 = vld [vmem:[#allocation4 + $0x38] sm:$0xff]  }
 0x215   : > { %4094 = vmatpush3.bf16.msra.mxu1 %v4593_v0  ;;  %2414 = vmatprep.mubr.bf16.mxu1 %v2283_v48  ;;  %v4621_v0 = vld [vmem:[#allocation4 + $0x30] sm:$0xff]   ;;  %v5487_v48 = vld [vmem:[#allocation2 + $0x8] sm:$0xff] }
 0x216   : > { %4095 = vmatprep.subr.bf16.mxu1 %v4594_v46  ;;  %v4622_v46 = vld [vmem:[#allocation4 + $0x78] sm:$0xff]  }
 0x217   : > { %4198 = vmatpush3.bf16.msra.mxu0 %v4618_v43  ;;  %v4633_v43 = vld [vmem:[#allocation4 + $0xe0] sm:$0xff]  }
 0x218   : > { %4199 = vmatprep.subr.bf16.mxu0 %v4716_v15 }
 0x219   : > { %4096 = vmatpush3.bf16.msra.mxu1 %v4595_v49 }
 0x21a   : > { %4097 = vmatprep.subr.bf16.mxu1 %v4596_v50 }
 0x21b   : > { %4200 = vmatpush3.bf16.msra.mxu0 %v4620_v45  ;;  %v4635_v45 = vld [vmem:[#allocation4 + $0xe8] sm:$0xff]  }
 0x21c   : > { %4201 = vmatprep.subr.bf16.mxu0 %v5487_v48 }
 0x21d   : > { %4098 = vmatpush3.bf16.msra.mxu1 %v4597_v51 }
 0x21e   : > { %4099 = vmatprep.subr.bf16.mxu1 %v4598_v52 }
 0x21f   : > { %4202 = vmatpush3.bf16.msra.mxu0 %v4622_v46  ;;  %v4637_v46 = vld [vmem:[#allocation4 + $0xf0] sm:$0xff]  }
 0x220   : > { %4227 = vmatprep.subr.bf16.mxu0 %v5487_v48 }
 0x221   : > { %4100 = vmatpush3.bf16.msra.mxu1 %v4599_v53 }
 0x222   : > { %4101 = vmatprep.subr.bf16.mxu1 %v4600_v55 }
 0x225   : > { %4102 = vmatpush3.bf16.msra.mxu1 %v4601_v56 }
 0x226   : > { %4103 = vmatprep.subr.bf16.mxu1 %v4602_v57 }
 0x229   : > { %4104 = vmatpush3.bf16.msra.mxu1 %v4603_v58 }
 0x22a   : > { %4105 = vmatprep.subr.bf16.mxu1 %v4604_v60 }
 0x22d   : > { %4106 = vmatpush3.bf16.msra.mxu1 %v4605_v59 }
 0x22e   : > { %4107 = vmatprep.subr.bf16.mxu1 %v4606_v12 }
 0x231   : > { %4108 = vmatpush3.bf16.msra.mxu1 %v4607_v3 }
 0x232   : > { %4207 = vmatprep.subr.bf16.mxu1 %v4716_v15 }
 0x234   : > { %2415 = vmatmul.mubr.bf16.vlgmr.msra.gmra.mrb[20].mxu1 %v2280_v6 }
 0x235   : > { %4208 = vmatpush3.bf16.msra.mxu1 %v4609_v22  ;;  %4223 = vmatprep.mubr.msk.bf16.mxu1 %vm4717_vm7, %v4716_v15 }
 0x236   : > { %4209 = vmatprep.subr.bf16.mxu1 %v4716_v15 }
 0x239   : > { %4210 = vmatpush3.bf16.msra.mxu1 %v4611_v24 }
 0x23a   : > { %4211 = vmatprep.subr.bf16.mxu1 %v4716_v15 }
 0x23d   : > { %4212 = vmatpush3.bf16.msra.mxu1 %v4613_v13 }
 0x23e   : > { %4213 = vmatprep.subr.bf16.mxu1 %v4716_v15 }
 0x241   : > { %4214 = vmatpush3.bf16.msra.mxu1 %v4615_v40  ;;  %v4630_v40 = vld [vmem:[#allocation4 + $0x98] sm:$0xff]  }
 0x242   : > { %4215 = vmatprep.subr.bf16.mxu1 %v4716_v15 }
 0x245   : > { %4216 = vmatpush3.bf16.msra.mxu1 %v4617_v42  ;;  %v4632_v42 = vld [vmem:[#allocation4 + $0xa0] sm:$0xff]  }
 0x246   : > { %4217 = vmatprep.subr.bf16.mxu1 %v4716_v15 }
 0x249   : > { %4218 = vmatpush3.bf16.msra.mxu1 %v4619_v44  ;;  %v4634_v44 = vld [vmem:[#allocation4 + $0xa8] sm:$0xff]  }
 0x24a   : > { %4219 = vmatprep.subr.bf16.mxu1 %v4716_v15 }
 0x24d   : > { %4220 = vmatpush3.bf16.msra.mxu1 %v4621_v0  ;;  %v4636_v0 = vld [vmem:[#allocation4 + $0xb0] sm:$0xff]  }
 0x24e   : > { %4221 = vmatprep.subr.bf16.mxu1 %v5487_v48 }
 0x251   : > { %4222 = vmatpush3.bf16.msra.mxu1 %v4623_v47  ;;  %v4638_v47 = vld [vmem:[#allocation4 + $0xb8] sm:$0xff]  }
 0x252   : > { %4247 = vmatprep.subr.bf16.mxu1 %v5487_v48 }
 0x267   : > { %v3955_v7 = vpop.f32.mrb[0].mxu1 }
 0x268   : > { %v3956_v8 = vpop.f32.mrb[1].mxu1 }
 0x269   : > { %v3957_v9 = vadd.f32 %v3956_v8, %v3955_v7  ;;  %v3958_v10 = vpop.f32.mrb[2].mxu1  ;;  %v4043_v62 = vpop.f32.mrb[4].mxu0 }
 0x26a   : > { %v3959_v11 = vpop.f32.mrb[3].mxu1  ;;  %v4044_v14 = vpop.f32.mrb[5].mxu0 }
 0x26b   : > { %v3960_v16 = vadd.f32 %v3959_v11, %v3958_v10  ;;  %v5465_v17 = vadd.f32 %v4044_v14, %v4043_v62  ;;  %v4046_v18 = vpop.f32.mrb[6].mxu0 }
 0x26c   : > { %v4047_v19 = vpop.f32.mrb[7].mxu0 }
 0x26d   : > { %v5467_v20 = vadd.f32 %v4047_v19, %v4046_v18 }
 0x287   : > { %v3977_v25 = vpop.f32.mrb[4].mxu1 }
 0x288   : > { %v3978_v26 = vpop.f32.mrb[5].mxu1 }
 0x289   : > { %v3979_v27 = vadd.f32 %v3978_v26, %v3977_v25  ;;  %v3980_v28 = vpop.f32.mrb[6].mxu1  ;;  %v4087_v29 = vpop.f32.mrb[8].mxu0 }
 0x28a   : > { %v3981_v30 = vpop.f32.mrb[7].mxu1  ;;  %v4088_v31 = vpop.f32.mrb[9].mxu0 }
 0x28b   : > { %v1214_v32 = vadd.f32 %v3979_v27, %v3957_v9  ;;  %v3982_v33 = vadd.f32 %v3981_v30, %v3980_v28  ;;  %v5475_v34 = vadd.f32 %v4088_v31, %v4087_v29  ;;  %v4090_v35 = vpop.f32.mrb[10].mxu0  ;;  %v4624_v29 = vld [vmem:[#allocation4 + $0x80] sm:$0xff]  }
 0x28c   : > { %v4091_v36 = vpop.f32.mrb[11].mxu0  ;;  %v4625_v30 = vld [vmem:[#allocation4 + $0xc0] sm:$0xff]  }
 0x28d   : > { %v1217_v37 = vadd.f32 %v3982_v33, %v3960_v16  ;;  %v4092_v38 = vadd.f32 %v4091_v36, %v4090_v35  ;;  %v4626_v36 = vld [vmem:[#allocation4 + $0x88] sm:$0xff]  }
 0x2a7   : > { %v3999_v49 = vpop.f32.mrb[8].mxu1 }
 0x2a8   : > { %v4000_v50 = vpop.f32.mrb[9].mxu1 }
 0x2a9   : > { %v4001_v51 = vadd.f32 %v4000_v50, %v3999_v49  ;;  %v4002_v15 = vpop.f32.mrb[10].mxu1  ;;  %v4639_v49 = vld [vmem:[#allocation4 + $0xf8] sm:$0xff]  }
 0x2aa   : > { %v4003_v52 = vpop.f32.mrb[11].mxu1 }
 0x2ab   : > { %v1435_v53 = vadd.f32 %v4001_v51, %v1214_v32  ;;  %v4004_v55 = vadd.f32 %v4003_v52, %v4002_v15  ;;  %v4640_v15 = vld [vmem:[#allocation4 + $0x100] sm:$0xff]  }
 0x2ac   : > { %v4641_v52 = vld [vmem:[#allocation4 + $0x140] sm:$0xff]  }
 0x2ad   : > { %v1436_v56 = vadd.f32 %v4004_v55, %v1217_v37  ;;  %v4627_v37 = vld [vmem:[#allocation4 + $0xc8] sm:$0xff]  }
 0x2ae   : > { %v4642_v55 = vld [vmem:[#allocation4 + $0x108] sm:$0xff]  }
 0x2c7   : > { %v4021_v57 = vpop.f32.mrb[12].mxu1 }
 0x2c8   : > { %v4022_v58 = vpop.f32.mrb[13].mxu1 }
 0x2c9   : > { %v4023_v60 = vadd.f32 %v4022_v58, %v4021_v57  ;;  %v4024_v61 = vpop.f32.mrb[14].mxu1  ;;  %v4644_v57 = vld [vmem:[#allocation4 + $0x110] sm:$0xff]  }
 0x2ca   : > { %v4025_v63 = vpop.f32.mrb[15].mxu1  ;;  %v4645_v58 = vld [vmem:[#allocation4 + $0x150] sm:$0xff]  }
 0x2cb   : > { %v1611_v59 = vadd.f32 %v4023_v60, %v1435_v53  ;;  %v4026_v12 = vadd.f32 %v4025_v63, %v4024_v61  ;;  %v4646_v60 = vld [vmem:[#allocation4 + $0x118] sm:$0xff]   ;;  %v4648_v63 = vld [vmem:[#allocation4 + $0x120] sm:$0xff]  }
 0x2cc   : > { %v4647_v61 = vld [vmem:[#allocation4 + $0x158] sm:$0xff]  }
 0x2cd   : > { %v1612_v1 = vadd.f32 %v4026_v12, %v1436_v56  ;;  %v1820_v2 = vadd.f32 %v5465_v17, %v1611_v59  ;;  %v3869_v17 = vld [vmem:[%s5575_s4] ss:$0 sm:$0xff]  ;;  %v4643_v56 = vld [vmem:[#allocation4 + $0x148] sm:$0xff]  }
 0x2ce   : > { %v4649_v59 = vld [vmem:[#allocation4 + $0x160] sm:$0xff]   ;;  %v4650_v12 = vld [vmem:[#allocation4 + $0x128] sm:$0xff]  }
 0x2cf   : > { %v1821_v3 = vadd.f32 %v5467_v20, %v1612_v1  ;;  %v4651_v1 = vld [vmem:[#allocation4 + $0x168] sm:$0xff]  }
 0x2e7   : > { %v4065_v4 = vpop.f32.mrb[16].mxu1 }
 0x2e8   : > { %v4066_v5 = vpop.f32.mrb[17].mxu1 }
 0x2e9   : > { %v4067_v6 = vadd.f32 %v4066_v5, %v4065_v4  ;;  %v4068_v7 = vpop.f32.mrb[18].mxu1  ;;  %v4654_v4 = vld [vmem:[#allocation4 + $0x138] sm:$0xff]  }
 0x2ea   : > { %v4069_v8 = vpop.f32.mrb[19].mxu1  ;;  %v4655_v5 = vld [vmem:[#allocation4 + $0x178] sm:$0xff]  }
 0x2eb   : > { %v2013_v9 = vadd.f32 %v4067_v6, %v1820_v2  ;;  %v4070_v10 = vadd.f32 %v4069_v8, %v4068_v7  ;;  %v4652_v2 = vld [vmem:[#allocation4 + $0x130] sm:$0xff]  }
 0x2ed   : > { %v2014_v62 = vadd.f32 %v4070_v10, %v1821_v3  ;;  %v2230_v11 = vadd.f32 %v5475_v34, %v2013_v9  ;;  %v4653_v3 = vld [vmem:[#allocation4 + $0x170] sm:$0xff]   ;;  %v4656_v10 = vld [vmem:[#allocation4 + $0x180] sm:$0xff]  }
 0x2ef   : > { %v2231_v14 = vadd.f32 %v4092_v38, %v2014_v62  ;;  %v4628_v38 = vld [vmem:[#allocation4 + $0x90] sm:$0xff]   ;;  %v4657_v62 = vld [vmem:[#allocation4 + $0x1c0] sm:$0xff]  }
 0x307   : > { %v4109_v16 = vpop.f32.mrb[20].mxu1 }
 0x308   : > { %v4110_v18 = vpop.f32.mrb[21].mxu1 }
 0x309   : > { %v4111_v19 = vadd.f32 %v4110_v18, %v4109_v16  ;;  %v4112_v21 = vpop.f32.mrb[22].mxu1  ;;  %v4658_v16 = vld [vmem:[#allocation4 + $0x188] sm:$0xff]  }
 0x30a   : > { %v4113_v20 = vpop.f32.mrb[23].mxu1  ;;  %v4659_v18 = vld [vmem:[#allocation4 + $0x1c8] sm:$0xff]  }
 0x30b   : > { %v2423_v22 = vadd.f32 %v4111_v19, %v2230_v11  ;;  %v4114_v23 = vadd.f32 %v4113_v20, %v4112_v21  ;;  %v4660_v19 = vld [vmem:[#allocation4 + $0x190] sm:$0xff]   ;;  %v4663_v20 = vld [vmem:[#allocation4 + $0x1d8] sm:$0xff]  }
 0x30c   : > { %v4661_v21 = vld [vmem:[#allocation4 + $0x1d0] sm:$0xff]  }
 0x30d   : > { %v2432_v24 = vadd.f32 %v3869_v17, %v2423_v22  ;;  %v2424_v54 = vadd.f32 %v4114_v23, %v2231_v14  ;;  %v4664_v22 = vld [vmem:[#allocation4 + $0x1a0] sm:$0xff]  }
 0x30e   : > { %v4665_v23 = vld [vmem:[#allocation4 + $0x1e0] sm:$0xff]  }
 0x30f   : > { %v2434_v13 = vmax.f32 %v2432_v24, 0.0  ;;  %v2433_v25 = vadd.f32 %v3869_v17, %v2424_v54  ;;  %v4662_v17 = vld [vmem:[#allocation4 + $0x198] sm:$0xff]   ;;  %v4666_v24 = vld [vmem:[#allocation4 + $0x1a8] sm:$0xff]  }
 0x310   : > { %v4667_v54 = vld [vmem:[#allocation4 + $0x1e8] sm:$0xff]  }
 0x311   : > { %2438 = vst [vmem:[#allocation3 + $0x8] sm:$0xff] %v2434_v13  ;;  %v2435_v26 = vmax.f32 %v2433_v25, 0.0  ;;  %v4669_v25 = vld [vmem:[#allocation4 + $0x1f0] sm:$0xff]  }
 0x313   : > { %2439 = vst [vmem:[#allocation3 + $0x10] sm:$0xff] %v2435_v26  ;;  %v5499_v27 = vpack.c.bf16 %v2435_v26, %v2434_v13  ;;  %v4668_v13 = vld [vmem:[#allocation4 + $0x1b0] sm:$0xff]   ;;  %v4670_v26 = vld [vmem:[#allocation4 + $0x1b8] sm:$0xff]  }
 0x318   : > { %v2459_v28 = vld [vmem:[#allocation3 + $0x6] sm:$0xff] }
 0x319   : > { %v2440_v32 = vld [vmem:[#allocation3 + $0x5] sm:$0xff] }
 0x31a   : > { %v2460_v31 = vld [vmem:[#allocation3 + $0xe] sm:$0xff] }
 0x31b   : > { %v2441_v33 = vld [vmem:[#allocation3 + $0xd] sm:$0xff]  ;;  %v2461_v34 = vpack.c.bf16 %v2460_v31, %v2459_v28 }
 0x31c   : > { %v2442_v35 = vpack.c.bf16 %v2441_v33, %v2440_v32  ;;  %v2658_v50 = vld [vmem:[#allocation3 + $0xf] sm:$0xff]  ;;  %v2657_v51 = vld [vmem:[#allocation3 + $0x7] sm:$0xff] }
 0x31d   : > { %4204 = vmatmul.mubr.bf16.vlgmr.msra.gmra.mrb[12].mxu0 %v2461_v34  ;;  %v2659_v53 = vpack.c.bf16 %v2658_v50, %v2657_v51  ;;  %v2879_v6 = vld [vmem:[#allocation3 + $0x9] sm:$0xff]  ;;  %v2880_v7 = vld [vmem:[#allocation3 + $0x11] sm:$0xff] }
 0x31e   : > { %4224 = vmatmul.mubr.bf16.vlgmr.msra.gmra.mrb[24].mxu1 %v2442_v35  ;;  %4228 = vmatpush3.bf16.msra.mxu0 %v4624_v29  ;;  %v2990_v8 = vld [vmem:[#allocation3 + $0xa] sm:$0xff]  ;;  %v2991_v9 = vld [vmem:[#allocation3 + $0x12] sm:$0xff]  ;;  %v2881_v11 = vpack.c.bf16 %v2880_v7, %v2879_v6 }
 0x31f   : > { %4248 = vmatpush3.bf16.msra.mxu1 %v4625_v30  ;;  %4229 = vmatprep.subr.bf16.mxu0 %v5487_v48  ;;  %v2992_v14 = vpack.c.bf16 %v2991_v9, %v2990_v8  ;;  %v3101_v28 = vld [vmem:[#allocation3 + $0xb] sm:$0xff]  ;;  %v3102_v29 = vld [vmem:[#allocation3 + $0x13] sm:$0xff] }
 0x320   : > { %4249 = vmatprep.subr.bf16.mxu1 %v5487_v48  ;;  %4243 = vmatprep.mubr.msk.bf16.mxu0 %vm4717_vm7, %v5487_v48  ;;  %v3212_v30 = vld [vmem:[#allocation3 + $0xc] sm:$0xff]  ;;  %v3213_v31 = vld [vmem:[#allocation3 + $0x14] sm:$0xff]  ;;  %v3103_v32 = vpack.c.bf16 %v3102_v29, %v3101_v28 }
 0x321   : > { %4263 = vmatprep.mubr.msk.bf16.mxu1 %vm4717_vm7, %v5487_v48  ;;  %v3214_v33 = vpack.c.bf16 %v3213_v31, %v3212_v30 }
 0x322   : > { %4230 = vmatpush3.bf16.msra.mxu0 %v4626_v36 }
 0x323   : > { %4250 = vmatpush3.bf16.msra.mxu1 %v4627_v37  ;;  %4231 = vmatprep.subr.bf16.mxu0 %v5487_v48 }
 0x324   : > { %4251 = vmatprep.subr.bf16.mxu1 %v5487_v48 }
 0x326   : > { %4232 = vmatpush3.bf16.msra.mxu0 %v4628_v38 }
 0x327   : > { %4252 = vmatpush3.bf16.msra.mxu1 %v4629_v39  ;;  %4233 = vmatprep.subr.bf16.mxu0 %v5487_v48 }
 0x328   : > { %4253 = vmatprep.subr.bf16.mxu1 %v5487_v48 }
 0x32a   : > { %4234 = vmatpush3.bf16.msra.mxu0 %v4630_v40 }
 0x32b   : > { %4254 = vmatpush3.bf16.msra.mxu1 %v4631_v41  ;;  %4235 = vmatprep.subr.bf16.mxu0 %v5487_v48 }
 0x32c   : > { %4255 = vmatprep.subr.bf16.mxu1 %v5487_v48 }
 0x32e   : > { %4236 = vmatpush3.bf16.msra.mxu0 %v4632_v42 }
 0x32f   : > { %4256 = vmatpush3.bf16.msra.mxu1 %v4633_v43  ;;  %4237 = vmatprep.subr.bf16.mxu0 %v5487_v48 }
 0x330   : > { %4257 = vmatprep.subr.bf16.mxu1 %v5487_v48 }
 0x332   : > { %4238 = vmatpush3.bf16.msra.mxu0 %v4634_v44 }
 0x333   : > { %4258 = vmatpush3.bf16.msra.mxu1 %v4635_v45  ;;  %4239 = vmatprep.subr.bf16.mxu0 %v5487_v48 }
 0x334   : > { %4259 = vmatprep.subr.bf16.mxu1 %v5487_v48 }
 0x336   : > { %4240 = vmatpush3.bf16.msra.mxu0 %v4636_v0 }
 0x337   : > { %4260 = vmatpush3.bf16.msra.mxu1 %v4637_v46  ;;  %4241 = vmatprep.subr.bf16.mxu0 %v5487_v48 }
 0x338   : > { %4261 = vmatprep.subr.bf16.mxu1 %v5487_v48 }
 0x33a   : > { %4242 = vmatpush3.bf16.msra.mxu0 %v4638_v47 }
 0x33b   : > { %4262 = vmatpush3.bf16.msra.mxu1 %v4639_v49  ;;  %4267 = vmatprep.subr.bf16.mxu0 %v5487_v48 }
 0x33c   : > { %4287 = vmatprep.subr.bf16.mxu1 %v5487_v48 }
 0x33d   : > { %4244 = vmatmul.mubr.bf16.vlgmr.msra.gmra.mrb[16].mxu0 %v2659_v53 }
 0x33e   : > { %4264 = vmatmul.mubr.bf16.vlgmr.msra.gmra.mrb[28].mxu1 %v5499_v27  ;;  %4268 = vmatpush3.bf16.msra.mxu0 %v4640_v15  ;;  %v4671_v27 = vld [vmem:[#allocation4 + $0x1f8] sm:$0xff]  }
 0x33f   : > { %4288 = vmatpush3.bf16.msra.mxu1 %v4641_v52  ;;  %4269 = vmatprep.subr.bf16.mxu0 %v5487_v48 }
 0x340   : > { %4289 = vmatprep.subr.bf16.mxu1 %v5487_v48  ;;  %4283 = vmatprep.mubr.msk.bf16.mxu0 %vm4717_vm7, %v5487_v48 }
 0x341   : > { %4303 = vmatprep.mubr.msk.bf16.mxu1 %vm4717_vm7, %v5487_v48 }
 0x342   : > { %4270 = vmatpush3.bf16.msra.mxu0 %v4642_v55 }
 0x343   : > { %4290 = vmatpush3.bf16.msra.mxu1 %v4643_v56  ;;  %4271 = vmatprep.subr.bf16.mxu0 %v5487_v48 }
 0x344   : > { %4291 = vmatprep.subr.bf16.mxu1 %v5487_v48 }
 0x346   : > { %4272 = vmatpush3.bf16.msra.mxu0 %v4644_v57 }
 0x347   : > { %4292 = vmatpush3.bf16.msra.mxu1 %v4645_v58  ;;  %4273 = vmatprep.subr.bf16.mxu0 %v5487_v48 }
 0x348   : > { %4293 = vmatprep.subr.bf16.mxu1 %v5487_v48 }
 0x34a   : > { %4274 = vmatpush3.bf16.msra.mxu0 %v4646_v60 }
 0x34b   : > { %4294 = vmatpush3.bf16.msra.mxu1 %v4647_v61  ;;  %4275 = vmatprep.subr.bf16.mxu0 %v5487_v48 }
 0x34c   : > { %4295 = vmatprep.subr.bf16.mxu1 %v5487_v48 }
 0x34e   : > { %4276 = vmatpush3.bf16.msra.mxu0 %v4648_v63 }
 0x34f   : > { %4296 = vmatpush3.bf16.msra.mxu1 %v4649_v59  ;;  %4277 = vmatprep.subr.bf16.mxu0 %v5487_v48 }
 0x350   : > { %4297 = vmatprep.subr.bf16.mxu1 %v5487_v48 }
 0x352   : > { %4278 = vmatpush3.bf16.msra.mxu0 %v4650_v12 }
 0x353   : > { %4298 = vmatpush3.bf16.msra.mxu1 %v4651_v1  ;;  %4279 = vmatprep.subr.bf16.mxu0 %v5487_v48 }
 0x354   : > { %4299 = vmatprep.subr.bf16.mxu1 %v5487_v48 }
 0x356   : > { %4280 = vmatpush3.bf16.msra.mxu0 %v4652_v2 }
 0x357   : > { %4300 = vmatpush3.bf16.msra.mxu1 %v4653_v3  ;;  %4281 = vmatprep.subr.bf16.mxu0 %v5487_v48 }
 0x358   : > { %4301 = vmatprep.subr.bf16.mxu1 %v5487_v48 }
 0x35a   : > { %4282 = vmatpush3.bf16.msra.mxu0 %v4654_v4 }
 0x35b   : > { %4302 = vmatpush3.bf16.msra.mxu1 %v4655_v5  ;;  %4307 = vmatprep.subr.bf16.mxu0 %v5487_v48 }
 0x35c   : > { %4327 = vmatprep.subr.bf16.mxu1 %v5487_v48 }
 0x35d   : > { %4284 = vmatmul.mubr.bf16.vlgmr.msra.gmra.mrb[20].mxu0 %v2881_v11 }
 0x35e   : > { %4304 = vmatmul.mubr.bf16.vlgmr.msra.gmra.mrb[32].mxu1 %v2992_v14  ;;  %4308 = vmatpush3.bf16.msra.mxu0 %v4656_v10 }
 0x35f   : > { %4328 = vmatpush3.bf16.msra.mxu1 %v4657_v62  ;;  %4309 = vmatprep.subr.bf16.mxu0 %v5487_v48  ;;  %v3934_v62 = vld [vmem:[%s5577_s6] ss:$0 sm:$0xff] }
 0x360   : > { %4329 = vmatprep.subr.bf16.mxu1 %v5487_v48  ;;  %4323 = vmatprep.mubr.msk.bf16.mxu0 %vm4717_vm7, %v5487_v48 }
 0x361   : > { %4343 = vmatprep.mubr.msk.bf16.mxu1 %vm4717_vm7, %v5487_v48 }
 0x362   : > { %4310 = vmatpush3.bf16.msra.mxu0 %v4658_v16 }
 0x363   : > { %4330 = vmatpush3.bf16.msra.mxu1 %v4659_v18  ;;  %4311 = vmatprep.subr.bf16.mxu0 %v5487_v48 }
 0x364   : > { %4331 = vmatprep.subr.bf16.mxu1 %v5487_v48 }
 0x366   : > { %4312 = vmatpush3.bf16.msra.mxu0 %v4660_v19 }
 0x367   : > { %4332 = vmatpush3.bf16.msra.mxu1 %v4661_v21  ;;  %4313 = vmatprep.subr.bf16.mxu0 %v5487_v48 }
 0x368   : > { %4333 = vmatprep.subr.bf16.mxu1 %v5487_v48 }
 0x36a   : > { %4314 = vmatpush3.bf16.msra.mxu0 %v4662_v17 }
 0x36b   : > { %4334 = vmatpush3.bf16.msra.mxu1 %v4663_v20  ;;  %4315 = vmatprep.subr.bf16.mxu0 %v5487_v48 }
 0x36c   : > { %4335 = vmatprep.subr.bf16.mxu1 %v5487_v48 }
 0x36e   : > { %4316 = vmatpush3.bf16.msra.mxu0 %v4664_v22 }
 0x36f   : > { %4336 = vmatpush3.bf16.msra.mxu1 %v4665_v23  ;;  %4317 = vmatprep.subr.bf16.mxu0 %v5487_v48 }
 0x370   : > { %4337 = vmatprep.subr.bf16.mxu1 %v5487_v48 }
 0x372   : > { %4318 = vmatpush3.bf16.msra.mxu0 %v4666_v24 }
 0x373   : > { %4338 = vmatpush3.bf16.msra.mxu1 %v4667_v54  ;;  %4319 = vmatprep.subr.bf16.mxu0 %v5487_v48 }
 0x374   : > { %4339 = vmatprep.subr.bf16.mxu1 %v5487_v48 }
 0x376   : > { %4320 = vmatpush3.bf16.msra.mxu0 %v4668_v13 }
 0x377   : > { %4340 = vmatpush3.bf16.msra.mxu1 %v4669_v25  ;;  %4321 = vmatprep.subr.bf16.mxu0 %v5487_v48 }
 0x378   : > { %4341 = vmatprep.subr.bf16.mxu1 %v5487_v48 }
 0x37a   : > { %4322 = vmatpush3.bf16.msra.mxu0 %v4670_v26 }
 0x37b   : > { %4342 = vmatpush3.bf16.msra.mxu1 %v4671_v27 }
 0x37d   : > { %4324 = vmatmul.mubr.bf16.vlgmr.msra.gmra.mrb[24].mxu0 %v3103_v32 }
 0x37e   : > { %4344 = vmatmul.mubr.bf16.vlgmr.msra.gmra.mrb[36].mxu1 %v3214_v33 }
 0x3f0   : > { %v2561_v34 = vpop.f32.mrb[12].mxu0 }
 0x3f1   : > { %v2650_v35 = vpop.f32.mrb[24].mxu1  ;;  %v4205_v37 = vpop.f32.mrb[13].mxu0 }
 0x3f2   : > { %v2651_v36 = vadd.f32 %v2650_v35, %v2561_v34  ;;  %v4225_v38 = vpop.f32.mrb[25].mxu1  ;;  %v2564_v39 = vpop.f32.mrb[14].mxu0 }
 0x3f3   : > { %v2653_v40 = vpop.f32.mrb[26].mxu1  ;;  %v4206_v42 = vpop.f32.mrb[15].mxu0 }
 0x3f4   : > { %v2654_v41 = vadd.f32 %v2653_v40, %v2564_v39  ;;  %v4226_v48 = vpop.f32.mrb[27].mxu1 }
 0x410   : > { %v2759_v43 = vpop.f32.mrb[16].mxu0 }
 0x411   : > { %v2870_v44 = vpop.f32.mrb[28].mxu1  ;;  %v2766_v45 = vadd.f32 %v2759_v43, %v2651_v36  ;;  %v4245_v0 = vpop.f32.mrb[17].mxu0 }
 0x412   : > { %v4265_v46 = vpop.f32.mrb[29].mxu1  ;;  %v2762_v47 = vpop.f32.mrb[18].mxu0 }
 0x413   : > { %v2873_v49 = vpop.f32.mrb[30].mxu1  ;;  %v2877_v50 = vadd.f32 %v2870_v44, %v2766_v45  ;;  %v2767_v51 = vadd.f32 %v2762_v47, %v2654_v41  ;;  %v4246_v15 = vpop.f32.mrb[19].mxu0 }
 0x414   : > { %v4266_v52 = vpop.f32.mrb[31].mxu1 }
 0x415   : > { %v2878_v53 = vadd.f32 %v2873_v49, %v2767_v51 }
 0x430   : > { %v2981_v55 = vpop.f32.mrb[20].mxu0 }
 0x431   : > { %v3092_v56 = vpop.f32.mrb[32].mxu1  ;;  %v2988_v57 = vadd.f32 %v2981_v55, %v2877_v50  ;;  %v4285_v58 = vpop.f32.mrb[21].mxu0 }
 0x432   : > { %v4305_v60 = vpop.f32.mrb[33].mxu1  ;;  %v2984_v61 = vpop.f32.mrb[22].mxu0 }
 0x433   : > { %v3095_v63 = vpop.f32.mrb[34].mxu1  ;;  %v3099_v59 = vadd.f32 %v3092_v56, %v2988_v57  ;;  %v2989_v12 = vadd.f32 %v2984_v61, %v2878_v53  ;;  %v4286_v1 = vpop.f32.mrb[23].mxu0 }
 0x434   : > { %v4306_v2 = vpop.f32.mrb[35].mxu1 }
 0x435   : > { %v3100_v3 = vadd.f32 %v3095_v63, %v2989_v12 }
 0x450   : > { %v3203_v4 = vpop.f32.mrb[24].mxu0 }
 0x451   : > { %v3314_v5 = vpop.f32.mrb[36].mxu1  ;;  %v3210_v6 = vadd.f32 %v3203_v4, %v3099_v59  ;;  %v4325_v7 = vpop.f32.mrb[25].mxu0 }
 0x452   : > { %v4345_v8 = vpop.f32.mrb[37].mxu1  ;;  %v3206_v9 = vpop.f32.mrb[26].mxu0 }
 0x453   : > { %v3317_v10 = vpop.f32.mrb[38].mxu1  ;;  %v3321_v11 = vadd.f32 %v3314_v5, %v3210_v6  ;;  %v3211_v14 = vadd.f32 %v3206_v9, %v3100_v3  ;;  %v4326_v16 = vpop.f32.mrb[27].mxu0 }
 0x454   : > { %v4346_v18 = vpop.f32.mrb[39].mxu1 }
 0x455   : > { %v3322_v19 = vadd.f32 %v3317_v10, %v3211_v14  ;;  %v3330_v21 = vadd.f32 %v3934_v62, %v3321_v11 }
 0x457   : > { %v3332_v17 = vmax.f32 %v3330_v21, 0.0  ;;  %v3331_v20 = vadd.f32 %v3934_v62, %v3322_v19 }
 0x459   : > { %3334 = vxpose.xlu0.b32.start [1/2] (short) (narrow) %v3332_v17, 32  ;;  %v3333_v22 = vmax.f32 %v3331_v20, 0.0 }
 0x45d   : > { %3335 = vxpose.xlu0.b32.end [2/2] (short) (narrow) %v3333_v22, 32 }
 0x4d9   : > { %v3350_v23 = vpop.trf.xlu0 }
 0x4da   : > { %3367 = vst.msk [vmem:[%s293_s18] sm:$0xff] %vm3366_vm8, %v3350_v23 }
 0x4dd   : > { %v3351_v24 = vpop.trf.xlu0 }
 0x4de   : > { %3368 = vst.msk [vmem:[%s293_s18 + $0x8] sm:$0xff] %vm3366_vm8, %v3351_v24 }
 0x4e1   : > { %v3352_v54 = vpop.trf.xlu0 }
 0x4e2   : > { %3369 = vst.msk [vmem:[%s293_s18 + $0x10] sm:$0xff] %vm3366_vm8, %v3352_v54 }
 0x4e5   : > { %v3353_v13 = vpop.trf.xlu0 }
 0x4e6   : > { %3370 = vst.msk [vmem:[%s293_s18 + $0x18] sm:$0xff] %vm3366_vm8, %v3353_v13 }
 0x4e7 PF: > { %s18_s24 = sadd.s32 1, %s4711_s24  }
 0x4e8   : > { %p15_p3 = scmp.ge.s32.totalorder %s18_s24, 4  }
 0x4ea   :  { %17 = sbr.rel (!%p15_p3) target bundleno = 1 (0x1), region = 97 }
 0x4f1   :  { %3392 = vsyncpa [#allocation5], 1 }
 0x4f2   :  { %3394 = vsyncpa [#allocation5 + $0x1], 1 }

</bundles_post_ra>
